<compile_context>
chip_gen: v6e
topology: v6e:2x2x1
jax: 0.10.0
libtpu: 0.0.40
codegen_flags: <defaults>
</compile_context>

<pallas_src>
import functools

import jax
import jax.numpy as jnp
from jax.experimental import pallas as pl
from jax.experimental.pallas import tpu as pltpu

LANE = 128
NEG_INF = -1e30


def _round_up(v, m):
    return ((v + m - 1) // m) * m


# ---------------------------------------------------------------------------
# Kernel: one GraphSAGE conv layer (+ optional fused mlp/log_softmax head)
# ---------------------------------------------------------------------------
def _sage_layer_kernel(*refs, fuse_head):
    if fuse_head:
        (x_self_ref, x_agg_ref, adj_ref, inv_deg_ref,
         w_self_ref, w_neigh_ref, b_ref, w_mlp_ref, b_mlp_ref,
         o_ref, acc_ref) = refs
    else:
        (x_self_ref, x_agg_ref, adj_ref, inv_deg_ref,
         w_self_ref, w_neigh_ref, b_ref,
         o_ref, acc_ref) = refs

    k = pl.program_id(1)

    @pl.when(k == 0)
    def _():
        acc_ref[...] = jnp.zeros_like(acc_ref)

    # Neighbor-sum accumulation over adjacency column tiles.
    # int8 adjacency (0/1) -> bf16 on the VPU (hidden under MXU/DMA), then a
    # bf16 x bf16 MXU pass with f32 accumulation in the resident scratch.
    acc_ref[...] += jnp.dot(adj_ref[...].astype(jnp.bfloat16), x_agg_ref[...],
                            preferred_element_type=jnp.float32)

    @pl.when(k == pl.num_programs(1) - 1)
    def _():
        # Mean-style aggregation: (adj @ x) * 1/(deg+1); inv_deg precomputed
        # once in the wrapper.  Cast to bf16 so every finalize matmul runs at
        # bf16 MXU rate with f32 accumulation.
        neigh = (acc_ref[...] * inv_deg_ref[...]).astype(jnp.bfloat16)
        h = (jnp.dot(x_self_ref[...], w_self_ref[...],
                     preferred_element_type=jnp.float32)
             + jnp.dot(neigh, w_neigh_ref[...],
                       preferred_element_type=jnp.float32)
             + b_ref[...])
        h = jnp.maximum(h, 0.0)                      # ReLU
        if not fuse_head:
            o_ref[...] = h.astype(o_ref.dtype)
        else:
            # dropout == identity (eval mode); fused Linear(nhid, nclass)
            # + log_softmax.  Padded class lanes carry a -1e30 f32 bias so
            # they are excluded from the max/sum automatically (logits stay
            # f32 throughout, so -1e30 does not overflow).
            logits = (jnp.dot(h.astype(jnp.bfloat16), w_mlp_ref[...],
                              preferred_element_type=jnp.float32)
                      + b_mlp_ref[...])
            m = jnp.max(logits, axis=1, keepdims=True)
            shifted = logits - m
            lse = jnp.log(jnp.sum(jnp.exp(shifted), axis=1, keepdims=True))
            o_ref[...] = (shifted - lse).astype(o_ref.dtype)


# ---------------------------------------------------------------------------
# Wrapper for one layer (padded shapes in, padded shapes out)
# ---------------------------------------------------------------------------
def _sage_layer(x, adj, inv_deg, w_self, w_neigh, b,
                w_mlp=None, b_mlp=None, *, tm, tk, vmem_limit):
    n_pad = adj.shape[0]
    f_pad = x.shape[1]
    h_pad = w_self.shape[1]
    fuse_head = w_mlp is not None
    out_dim = w_mlp.shape[1] if fuse_head else h_pad
    out_dtype = jnp.float32 if fuse_head else jnp.bfloat16

    grid = (n_pad // tm, n_pad // tk)

    # NOTE: the weight/bias blocks are grid-invariant (index_map == (0,0)); the
    # bf16 storage keeps their (double-buffered) VMEM footprint well inside the
    # per-generation budget, so no pipeline_mode override is needed here.
    in_specs = [
        pl.BlockSpec((tm, f_pad), lambda i, k: (i, 0)),        # x  (self rows)
        pl.BlockSpec((tk, f_pad), lambda i, k: (k, 0)),        # x  (agg rows)
        pl.BlockSpec((tm, tk),    lambda i, k: (i, k)),        # adj tile (int8)
        pl.BlockSpec((tm, 1),     lambda i, k: (i, 0)),        # 1/(deg+1)
        pl.BlockSpec((f_pad, h_pad), lambda i, k: (0, 0)),     # W_self (bf16)
        pl.BlockSpec((f_pad, h_pad), lambda i, k: (0, 0)),     # W_neigh (bf16)
        pl.BlockSpec((1, h_pad),  lambda i, k: (0, 0)),        # bias (f32)
    ]
    args = [x, x, adj, inv_deg, w_self, w_neigh, b]
    if fuse_head:
        in_specs += [
            pl.BlockSpec((h_pad, out_dim), lambda i, k: (0, 0)),   # W_mlp (bf16)
            pl.BlockSpec((1, out_dim),     lambda i, k: (0, 0)),   # b_mlp (f32)
        ]
        args += [w_mlp, b_mlp]

    kernel = functools.partial(_sage_layer_kernel, fuse_head=fuse_head)
    return pl.pallas_call(
        kernel,
        out_shape=jax.ShapeDtypeStruct((n_pad, out_dim), out_dtype),
        grid_spec=pltpu.PrefetchScalarGridSpec(
            num_scalar_prefetch=0,
            grid=grid,
            in_specs=in_specs,
            out_specs=pl.BlockSpec((tm, out_dim), lambda i, k: (i, 0)),
            scratch_shapes=[pltpu.VMEM((tm, f_pad), jnp.float32)],
        ),
        compiler_params=pltpu.CompilerParams(
            # Row tiles parallel (megacore on v7x), adjacency-column reduction
            # last and arbitrary (accumulator stays resident in VMEM).
            dimension_semantics=("parallel", "arbitrary"),
            vmem_limit_bytes=vmem_limit,
        ),
    )(*args)


# ---------------------------------------------------------------------------
# Full forward pass
# ---------------------------------------------------------------------------
def _device_is_v7():
    try:
        return "v7" in jax.devices()[0].device_kind.lower()
    except Exception:
        return False


@jax.jit
def sage_forward(x, adj, params):
    n, nfeat = x.shape
    nhid = params["w1_self"].shape[1]
    nclass = params["w_mlp"].shape[1]

    f_pad = _round_up(nfeat, LANE)
    h_pad = _round_up(nhid, LANE)
    c_pad = _round_up(nclass, LANE)

    is_v7 = _device_is_v7()
    # Generation-aware VMEM budget: v7x has 64 MiB / TC, v5e/v6e have 128 MiB.
    vmem_limit = (48 if is_v7 else 64) * 1024 * 1024

    # Tile selection:
    #   * small graphs: whole (128-padded) graph as one block; on v7x split the
    #     row axis in two so both TensorCores get a "parallel" tile.
    #   * large graphs: 512x512 adjacency tiles (AI ~2x vs 256-row tiles, far
    #     fewer per-step overheads), comfortably inside the VMEM budget with
    #     bf16 weights + int8 adjacency.
    if n <= 1024:
        n_pad = _round_up(max(n, LANE), LANE)
        tk = n_pad
        tm = n_pad // 2 if (is_v7 and n_pad >= 256) else n_pad
    else:
        n_pad = _round_up(n, 512)
        tm, tk = 512, 512

    def pad2(a, r, c, dtype, fill=0.0):
        out = jnp.full((r, c), fill, dtype)
        return out.at[:a.shape[0], :a.shape[1]].set(a.astype(dtype))

    # deg / inv_deg from the ORIGINAL (unpadded) adjacency — shared by both
    # conv layers; padded rows get inv_deg 1 (harmless, sliced off at the end).
    inv_deg_n = 1.0 / (jnp.sum(adj.astype(jnp.float32), axis=1, keepdims=True) + 1.0)
    inv_deg = pad2(inv_deg_n, n_pad, 1, jnp.float32, fill=1.0)

    # Binary adjacency stored as int8 (exact); cast to bf16 inside the kernel.
    adj_p = pad2(adj, n_pad, n_pad, jnp.int8)
    x_p = pad2(x, n_pad, f_pad, jnp.bfloat16)

    # Weights in bf16 (MXU-rate finalize matmuls, half the HBM/VMEM traffic);
    # biases stay f32 (tiny, keeps the -1e30 padded-class trick exact).
    w1s = pad2(params["w1_self"], f_pad, h_pad, jnp.bfloat16)
    w1n = pad2(params["w1_neigh"], f_pad, h_pad, jnp.bfloat16)
    b1 = pad2(params["b1"], 1, h_pad, jnp.float32)
    w2s = pad2(params["w2_self"], h_pad, h_pad, jnp.bfloat16)
    w2n = pad2(params["w2_neigh"], h_pad, h_pad, jnp.bfloat16)
    b2 = pad2(params["b2"], 1, h_pad, jnp.float32)
    wm = pad2(params["w_mlp"], h_pad, c_pad, jnp.bfloat16)
    bm = pad2(params["b_mlp"], 1, c_pad, jnp.float32, fill=NEG_INF)

    # x = relu(sage1(x, adj)); dropout == identity in eval mode
    h1 = _sage_layer(x_p, adj_p, inv_deg, w1s, w1n, b1,
                     tm=tm, tk=tk, vmem_limit=vmem_limit)
    # x = dropout(relu(sage2(x, adj))); x = mlp(x); log_softmax(dim=1)
    # -> fused into a single kernel: the (N, nhid) intermediate never hits HBM.
    out = _sage_layer(h1, adj_p, inv_deg, w2s, w2n, b2, wm, bm,
                      tm=tm, tk=tk, vmem_limit=vmem_limit)
    return out[:n, :nclass]


# ---------------------------------------------------------------------------
# Pure-JAX reference (f32) for correctness checking
# ---------------------------------------------------------------------------
def sage_reference(x, adj, params):
    def conv(xx, ws, wn, b):
        deg = jnp.sum(adj, axis=1, keepdims=True) + 1.0
        neigh = (adj @ xx) / deg
        return xx @ ws + neigh @ wn + b

    h = jax.nn.relu(conv(x, params["w1_self"], params["w1_neigh"], params["b1"]))
    h = jax.nn.relu(conv(h, params["w2_self"], params["w2_neigh"], params["b2"]))
    logits = h @ params["w_mlp"] + params["b_mlp"]
    return jax.nn.log_softmax(logits, axis=1)


def init_params(key, nfeat, nhid, nclass):
    ks = jax.random.split(key, 8)

    # GraphSageConv weights: PyTorch Linear(2*in, out) split into self/neigh
    # halves, stored transposed as (in, out).
    def lin(k, fan_in, shape):
        bound = 1.0 / jnp.sqrt(fan_in)
        return jax.random.uniform(k, shape, jnp.float32, -bound, bound)

    return {
        "w1_self":  lin(ks[0], 2 * nfeat, (nfeat, nhid)),
        "w1_neigh": lin(ks[1], 2 * nfeat, (nfeat, nhid)),
        "b1":       lin(ks[2], 2 * nfeat, (1, nhid)),
        "w2_self":  lin(ks[3], 2 * nhid, (nhid, nhid)),
        "w2_neigh": lin(ks[4], 2 * nhid, (nhid, nhid)),
        "b2":       lin(ks[5], 2 * nhid, (1, nhid)),
        # reset_parameters(): nn.init.normal_(mlp.weight, std=0.05)
        "w_mlp":    0.05 * jax.random.normal(ks[6], (nhid, nclass), jnp.float32),
        "b_mlp":    lin(ks[7], nhid, (1, nclass)),
    }


if __name__ == "__main__":
    key = jax.random.PRNGKey(0)
    k_x, k_adj, k_p = jax.random.split(key, 3)

    N, NFEAT, NHID, NCLASS = 16, 32, 32, 4

    x = jax.random.normal(k_x, (N, NFEAT), jnp.float32)
    # random symmetric binary adjacency (no self loops)
    a = (jax.random.uniform(k_adj, (N, N)) < 0.3).astype(jnp.float32)
    adj = jnp.clip(a + a.T, 0.0, 1.0) * (1.0 - jnp.eye(N, dtype=jnp.float32))

    params = init_params(k_p, NFEAT, NHID, NCLASS)

    out = sage_forward(x, adj, params)
    jax.block_until_ready(out)

    ref = sage_reference(x, adj, params)

    assert out.shape == (N, NCLASS)
    # rows of log_softmax should exp-sum to 1 (softmax math stays f32)
    assert jnp.allclose(jnp.sum(jnp.exp(out), axis=1), 1.0, atol=1e-3)
    # bf16 storage of adjacency/activations/weights (intentional, inference
    # mode) -> loose tolerance vs f32 reference
    assert jnp.allclose(out, ref, atol=1e-1), float(jnp.max(jnp.abs(out - ref)))
    print("KERNEL_OK")
</pallas_src>

<mosaic_0001>
module attributes {stable_mosaic.version = 11 : i64} {
  func.func @_sage_layer_kernel(%arg0: i32, %arg1: i32, %arg2: memref<128x128xbf16, #tpu.memory_space<vmem>>, %arg3: memref<128x128xbf16, #tpu.memory_space<vmem>>, %arg4: memref<128x128xi8, #tpu.memory_space<vmem>>, %arg5: memref<128x1xf32, #tpu.memory_space<vmem>>, %arg6: memref<128x128xbf16, #tpu.memory_space<vmem>>, %arg7: memref<128x128xbf16, #tpu.memory_space<vmem>>, %arg8: memref<1x128xf32, #tpu.memory_space<vmem>>, %arg9: memref<128x128xbf16, #tpu.memory_space<vmem>>, %arg10: memref<128x128xf32, #tpu.memory_space<vmem>>) attributes {dimension_semantics = [#tpu.dimension_semantics<parallel>, #tpu.dimension_semantics<arbitrary>], iteration_bounds = array<i64: 1, 1>, scalar_prefetch = 0 : i64, scratch_operands = 1 : i64, tpu.core_type = #tpu.core_type<tc>, window_params = [{transform_indices = @transform_0, window_bounds = array<i64: 128, 128>}, {transform_indices = @transform_1, window_bounds = array<i64: 128, 128>}, {transform_indices = @transform_2, window_bounds = array<i64: 128, 128>}, {transform_indices = @transform_3, window_bounds = array<i64: 128, 1>}, {pipeline_mode = #tpu.pipeline_mode<synchronous>, transform_indices = @transform_4, window_bounds = array<i64: 128, 128>}, {pipeline_mode = #tpu.pipeline_mode<synchronous>, transform_indices = @transform_5, window_bounds = array<i64: 128, 128>}, {pipeline_mode = #tpu.pipeline_mode<synchronous>, transform_indices = @transform_6, window_bounds = array<i64: 1, 128>}, {transform_indices = @transform_7, window_bounds = array<i64: 128, 128>}]} {
    %c0_i32 = arith.constant 0 : i32
    %0 = arith.cmpi eq, %arg1, %c0_i32 : i32
    %1 = arith.extui %0 : i1 to i32
    %c0_i32_0 = arith.constant 0 : i32
    %2 = arith.cmpi ne, %1, %c0_i32_0 : i32
    scf.if %2 {
      %cst_10 = arith.constant 0.000000e+00 : f32
      %13 = vector.broadcast %cst_10 : f32 to vector<128x128xf32>
      %c0_11 = arith.constant 0 : index
      %c0_12 = arith.constant 0 : index
      %14 = vector.load %arg10[%c0_11, %c0_12] : memref<128x128xf32, #tpu.memory_space<vmem>>, vector<128x128xf32>
      tpu.vector_store %arg10[%c0_11, %c0_12], %13 {strides = array<i32>} : memref<128x128xf32, #tpu.memory_space<vmem>>, vector<128x128xf32>,
    } else {
    }
    %c0 = arith.constant 0 : index
    %c0_1 = arith.constant 0 : index
    %3 = vector.load %arg10[%c0, %c0_1] : memref<128x128xf32, #tpu.memory_space<vmem>>, vector<128x128xf32>
    %c0_2 = arith.constant 0 : index
    %c0_3 = arith.constant 0 : index
    %4 = vector.load %arg4[%c0_2, %c0_3] : memref<128x128xi8, #tpu.memory_space<vmem>>, vector<128x128xi8>
    %5 = arith.sitofp %4 : vector<128x128xi8> to vector<128x128xbf16>
    %c0_4 = arith.constant 0 : index
    %c0_5 = arith.constant 0 : index
    %6 = vector.load %arg3[%c0_4, %c0_5] : memref<128x128xbf16, #tpu.memory_space<vmem>>, vector<128x128xbf16>
    %cst = arith.constant dense<0.000000e+00> : vector<128x128xf32>
    %7 = tpu.matmul %5, %6, %cst {dimension_numbers = #tpu.dot_dimension_numbers<[1], [0], [0], [1], [0, 0, 1, 1], [], []>} : vector<128x128xbf16>, vector<128x128xbf16>, vector<128x128xf32> -> vector<128x128xf32>
    %8 = arith.addf %3, %7 : vector<128x128xf32>
    %c0_6 = arith.constant 0 : index
    %c0_7 = arith.constant 0 : index
    %9 = vector.load %arg10[%c0_6, %c0_7] : memref<128x128xf32, #tpu.memory_space<vmem>>, vector<128x128xf32>
    tpu.vector_store %arg10[%c0_6, %c0_7], %8 {strides = array<i32>} : memref<128x128xf32, #tpu.memory_space<vmem>>, vector<128x128xf32>,
    %c0_i32_8 = arith.constant 0 : i32
    %10 = arith.cmpi eq, %arg1, %c0_i32_8 : i32
    %11 = arith.extui %10 : i1 to i32
    %c0_i32_9 = arith.constant 0 : i32
    %12 = arith.cmpi ne, %11, %c0_i32_9 : i32
    scf.if %12 {
      %c0_10 = arith.constant 0 : index
      %c0_11 = arith.constant 0 : index
      %13 = vector.load %arg10[%c0_10, %c0_11] : memref<128x128xf32, #tpu.memory_space<vmem>>, vector<128x128xf32>
      %c0_12 = arith.constant 0 : index
      %c0_13 = arith.constant 0 : index
      %14 = vector.load %arg5[%c0_12, %c0_13] : memref<128x1xf32, #tpu.memory_space<vmem>>, vector<128x1xf32>
      %15 = vector.broadcast %14 : vector<128x1xf32> to vector<128x128xf32>
      %16 = arith.mulf %13, %15 : vector<128x128xf32>
      %17 = arith.truncf %16 : vector<128x128xf32> to vector<128x128xbf16>
      %c0_14 = arith.constant 0 : index
      %c0_15 = arith.constant 0 : index
      %18 = vector.load %arg2[%c0_14, %c0_15] : memref<128x128xbf16, #tpu.memory_space<vmem>>, vector<128x128xbf16>
      %c0_16 = arith.constant 0 : index
      %c0_17 = arith.constant 0 : index
      %19 = vector.load %arg6[%c0_16, %c0_17] : memref<128x128xbf16, #tpu.memory_space<vmem>>, vector<128x128xbf16>
      %cst_18 = arith.constant dense<0.000000e+00> : vector<128x128xf32>
      %20 = tpu.matmul %18, %19, %cst_18 {dimension_numbers = #tpu.dot_dimension_numbers<[1], [0], [0], [1], [0, 0, 1, 1], [], []>} : vector<128x128xbf16>, vector<128x128xbf16>, vector<128x128xf32> -> vector<128x128xf32>
      %c0_19 = arith.constant 0 : index
      %c0_20 = arith.constant 0 : index
      %21 = vector.load %arg7[%c0_19, %c0_20] : memref<128x128xbf16, #tpu.memory_space<vmem>>, vector<128x128xbf16>
      %cst_21 = arith.constant dense<0.000000e+00> : vector<128x128xf32>
      %22 = tpu.matmul %17, %21, %cst_21 {dimension_numbers = #tpu.dot_dimension_numbers<[1], [0], [0], [1], [0, 0, 1, 1], [], []>} : vector<128x128xbf16>, vector<128x128xbf16>, vector<128x128xf32> -> vector<128x128xf32>
      %23 = arith.addf %20, %22 : vector<128x128xf32>
      %c0_22 = arith.constant 0 : index
      %c0_23 = arith.constant 0 : index
      %24 = vector.load %arg8[%c0_22, %c0_23] : memref<1x128xf32, #tpu.memory_space<vmem>>, vector<1x128xf32>
      %25 = vector.broadcast %24 : vector<1x128xf32> to vector<128x128xf32>
      %26 = arith.addf %23, %25 : vector<128x128xf32>
      %cst_24 = arith.constant 0.000000e+00 : f32
      %27 = vector.broadcast %cst_24 : f32 to vector<128x128xf32>
      %28 = arith.maximumf %26, %27 : vector<128x128xf32>
      %29 = arith.truncf %28 : vector<128x128xf32> to vector<128x128xbf16>
      %c0_25 = arith.constant 0 : index
      %c0_26 = arith.constant 0 : index
      %30 = vector.load %arg9[%c0_25, %c0_26] : memref<128x128xbf16, #tpu.memory_space<vmem>>, vector<128x128xbf16>
      tpu.vector_store %arg9[%c0_25, %c0_26], %29 {strides = array<i32>} : memref<128x128xbf16, #tpu.memory_space<vmem>>, vector<128x128xbf16>,
    } else {
    }
    return
  }
  func.func @transform_0(%arg0: i32, %arg1: i32) -> (i32, i32) {
    %c0_i32 = arith.constant 0 : i32
    %c0_i32_0 = arith.constant 0 : i32
    return %arg0, %c0_i32 : i32, i32
  }
  func.func @transform_1(%arg0: i32, %arg1: i32) -> (i32, i32) {
    %c0_i32 = arith.constant 0 : i32
    %c0_i32_0 = arith.constant 0 : i32
    return %arg1, %c0_i32 : i32, i32
  }
  func.func @transform_2(%arg0: i32, %arg1: i32) -> (i32, i32) {
    %c0_i32 = arith.constant 0 : i32
    return %arg0, %arg1 : i32, i32
  }
  func.func @transform_3(%arg0: i32, %arg1: i32) -> (i32, i32) {
    %c0_i32 = arith.constant 0 : i32
    %c0_i32_0 = arith.constant 0 : i32
    return %arg0, %c0_i32 : i32, i32
  }
  func.func @transform_4(%arg0: i32, %arg1: i32) -> (i32, i32) {
    %c0_i32 = arith.constant 0 : i32
    %c0_i32_0 = arith.constant 0 : i32
    %c0_i32_1 = arith.constant 0 : i32
    return %c0_i32, %c0_i32_0 : i32, i32
  }
  func.func @transform_5(%arg0: i32, %arg1: i32) -> (i32, i32) {
    %c0_i32 = arith.constant 0 : i32
    %c0_i32_0 = arith.constant 0 : i32
    %c0_i32_1 = arith.constant 0 : i32
    return %c0_i32, %c0_i32_0 : i32, i32
  }
  func.func @transform_6(%arg0: i32, %arg1: i32) -> (i32, i32) {
    %c0_i32 = arith.constant 0 : i32
    %c0_i32_0 = arith.constant 0 : i32
    %c0_i32_1 = arith.constant 0 : i32
    return %c0_i32, %c0_i32_0 : i32, i32
  }
  func.func @transform_7(%arg0: i32, %arg1: i32) -> (i32, i32) {
    %c0_i32 = arith.constant 0 : i32
    %c0_i32_0 = arith.constant 0 : i32
    return %arg0, %c0_i32 : i32, i32
  }
}

module attributes {stable_mosaic.version = 11 : i64} {
  func.func @_sage_layer_kernel(%arg0: i32, %arg1: i32, %arg2: memref<128x128xbf16, #tpu.memory_space<vmem>>, %arg3: memref<128x128xbf16, #tpu.memory_space<vmem>>, %arg4: memref<128x128xi8, #tpu.memory_space<vmem>>, %arg5: memref<128x1xf32, #tpu.memory_space<vmem>>, %arg6: memref<128x128xbf16, #tpu.memory_space<vmem>>, %arg7: memref<128x128xbf16, #tpu.memory_space<vmem>>, %arg8: memref<1x128xf32, #tpu.memory_space<vmem>>, %arg9: memref<128x128xbf16, #tpu.memory_space<vmem>>, %arg10: memref<1x128xf32, #tpu.memory_space<vmem>>, %arg11: memref<128x128xf32, #tpu.memory_space<vmem>>, %arg12: memref<128x128xf32, #tpu.memory_space<vmem>>) attributes {dimension_semantics = [#tpu.dimension_semantics<parallel>, #tpu.dimension_semantics<arbitrary>], iteration_bounds = array<i64: 1, 1>, scalar_prefetch = 0 : i64, scratch_operands = 1 : i64, tpu.core_type = #tpu.core_type<tc>, window_params = [{transform_indices = @transform_0, window_bounds = array<i64: 128, 128>}, {transform_indices = @transform_1, window_bounds = array<i64: 128, 128>}, {transform_indices = @transform_2, window_bounds = array<i64: 128, 128>}, {transform_indices = @transform_3, window_bounds = array<i64: 128, 1>}, {pipeline_mode = #tpu.pipeline_mode<synchronous>, transform_indices = @transform_4, window_bounds = array<i64: 128, 128>}, {pipeline_mode = #tpu.pipeline_mode<synchronous>, transform_indices = @transform_5, window_bounds = array<i64: 128, 128>}, {pipeline_mode = #tpu.pipeline_mode<synchronous>, transform_indices = @transform_6, window_bounds = array<i64: 1, 128>}, {pipeline_mode = #tpu.pipeline_mode<synchronous>, transform_indices = @transform_7, window_bounds = array<i64: 128, 128>}, {pipeline_mode = #tpu.pipeline_mode<synchronous>, transform_indices = @transform_8, window_bounds = array<i64: 1, 128>}, {transform_indices = @transform_9, window_bounds = array<i64: 128, 128>}]} {
    %c0_i32 = arith.constant 0 : i32
    %0 = arith.cmpi eq, %arg1, %c0_i32 : i32
    %1 = arith.extui %0 : i1 to i32
    %c0_i32_0 = arith.constant 0 : i32
    %2 = arith.cmpi ne, %1, %c0_i32_0 : i32
    scf.if %2 {
      %cst_10 = arith.constant 0.000000e+00 : f32
      %13 = vector.broadcast %cst_10 : f32 to vector<128x128xf32>
      %c0_11 = arith.constant 0 : index
      %c0_12 = arith.constant 0 : index
      %14 = vector.load %arg12[%c0_11, %c0_12] : memref<128x128xf32, #tpu.memory_space<vmem>>, vector<128x128xf32>
      tpu.vector_store %arg12[%c0_11, %c0_12], %13 {strides = array<i32>} : memref<128x128xf32, #tpu.memory_space<vmem>>, vector<128x128xf32>,
    } else {
    }
    %c0 = arith.constant 0 : index
    %c0_1 = arith.constant 0 : index
    %3 = vector.load %arg12[%c0, %c0_1] : memref<128x128xf32, #tpu.memory_space<vmem>>, vector<128x128xf32>
    %c0_2 = arith.constant 0 : index
    %c0_3 = arith.constant 0 : index
    %4 = vector.load %arg4[%c0_2, %c0_3] : memref<128x128xi8, #tpu.memory_space<vmem>>, vector<128x128xi8>
    %5 = arith.sitofp %4 : vector<128x128xi8> to vector<128x128xbf16>
    %c0_4 = arith.constant 0 : index
    %c0_5 = arith.constant 0 : index
    %6 = vector.load %arg3[%c0_4, %c0_5] : memref<128x128xbf16, #tpu.memory_space<vmem>>, vector<128x128xbf16>
    %cst = arith.constant dense<0.000000e+00> : vector<128x128xf32>
    %7 = tpu.matmul %5, %6, %cst {dimension_numbers = #tpu.dot_dimension_numbers<[1], [0], [0], [1], [0, 0, 1, 1], [], []>} : vector<128x128xbf16>, vector<128x128xbf16>, vector<128x128xf32> -> vector<128x128xf32>
    %8 = arith.addf %3, %7 : vector<128x128xf32>
    %c0_6 = arith.constant 0 : index
    %c0_7 = arith.constant 0 : index
    %9 = vector.load %arg12[%c0_6, %c0_7] : memref<128x128xf32, #tpu.memory_space<vmem>>, vector<128x128xf32>
    tpu.vector_store %arg12[%c0_6, %c0_7], %8 {strides = array<i32>} : memref<128x128xf32, #tpu.memory_space<vmem>>, vector<128x128xf32>,
    %c0_i32_8 = arith.constant 0 : i32
    %10 = arith.cmpi eq, %arg1, %c0_i32_8 : i32
    %11 = arith.extui %10 : i1 to i32
    %c0_i32_9 = arith.constant 0 : i32
    %12 = arith.cmpi ne, %11, %c0_i32_9 : i32
    scf.if %12 {
      %c0_10 = arith.constant 0 : index
      %c0_11 = arith.constant 0 : index
      %13 = vector.load %arg12[%c0_10, %c0_11] : memref<128x128xf32, #tpu.memory_space<vmem>>, vector<128x128xf32>
      %c0_12 = arith.constant 0 : index
      %c0_13 = arith.constant 0 : index
      %14 = vector.load %arg5[%c0_12, %c0_13] : memref<128x1xf32, #tpu.memory_space<vmem>>, vector<128x1xf32>
      %15 = vector.broadcast %14 : vector<128x1xf32> to vector<128x128xf32>
      %16 = arith.mulf %13, %15 : vector<128x128xf32>
      %17 = arith.truncf %16 : vector<128x128xf32> to vector<128x128xbf16>
      %c0_14 = arith.constant 0 : index
      %c0_15 = arith.constant 0 : index
      %18 = vector.load %arg2[%c0_14, %c0_15] : memref<128x128xbf16, #tpu.memory_space<vmem>>, vector<128x128xbf16>
      %c0_16 = arith.constant 0 : index
      %c0_17 = arith.constant 0 : index
      %19 = vector.load %arg6[%c0_16, %c0_17] : memref<128x128xbf16, #tpu.memory_space<vmem>>, vector<128x128xbf16>
      %cst_18 = arith.constant dense<0.000000e+00> : vector<128x128xf32>
      %20 = tpu.matmul %18, %19, %cst_18 {dimension_numbers = #tpu.dot_dimension_numbers<[1], [0], [0], [1], [0, 0, 1, 1], [], []>} : vector<128x128xbf16>, vector<128x128xbf16>, vector<128x128xf32> -> vector<128x128xf32>
      %c0_19 = arith.constant 0 : index
      %c0_20 = arith.constant 0 : index
      %21 = vector.load %arg7[%c0_19, %c0_20] : memref<128x128xbf16, #tpu.memory_space<vmem>>, vector<128x128xbf16>
      %cst_21 = arith.constant dense<0.000000e+00> : vector<128x128xf32>
      %22 = tpu.matmul %17, %21, %cst_21 {dimension_numbers = #tpu.dot_dimension_numbers<[1], [0], [0], [1], [0, 0, 1, 1], [], []>} : vector<128x128xbf16>, vector<128x128xbf16>, vector<128x128xf32> -> vector<128x128xf32>
      %23 = arith.addf %20, %22 : vector<128x128xf32>
      %c0_22 = arith.constant 0 : index
      %c0_23 = arith.constant 0 : index
      %24 = vector.load %arg8[%c0_22, %c0_23] : memref<1x128xf32, #tpu.memory_space<vmem>>, vector<1x128xf32>
      %25 = vector.broadcast %24 : vector<1x128xf32> to vector<128x128xf32>
      %26 = arith.addf %23, %25 : vector<128x128xf32>
      %cst_24 = arith.constant 0.000000e+00 : f32
      %27 = vector.broadcast %cst_24 : f32 to vector<128x128xf32>
      %28 = arith.maximumf %26, %27 : vector<128x128xf32>
      %29 = arith.truncf %28 : vector<128x128xf32> to vector<128x128xbf16>
      %c0_25 = arith.constant 0 : index
      %c0_26 = arith.constant 0 : index
      %30 = vector.load %arg9[%c0_25, %c0_26] : memref<128x128xbf16, #tpu.memory_space<vmem>>, vector<128x128xbf16>
      %cst_27 = arith.constant dense<0.000000e+00> : vector<128x128xf32>
      %31 = tpu.matmul %29, %30, %cst_27 {dimension_numbers = #tpu.dot_dimension_numbers<[1], [0], [0], [1], [0, 0, 1, 1], [], []>} : vector<128x128xbf16>, vector<128x128xbf16>, vector<128x128xf32> -> vector<128x128xf32>
      %c0_28 = arith.constant 0 : index
      %c0_29 = arith.constant 0 : index
      %32 = vector.load %arg10[%c0_28, %c0_29] : memref<1x128xf32, #tpu.memory_space<vmem>>, vector<1x128xf32>
      %33 = vector.broadcast %32 : vector<1x128xf32> to vector<128x128xf32>
      %34 = arith.addf %31, %33 : vector<128x128xf32>
      %cst_30 = arith.constant dense<0xFF800000> : vector<128xf32>
      %35 = vector.multi_reduction <maximumf>, %34, %cst_30 [1] : vector<128x128xf32> to vector<128xf32>
      %36 = vector.shape_cast %35 : vector<128xf32> to vector<128x1xf32>
      %37 = vector.broadcast %36 : vector<128x1xf32> to vector<128x128xf32>
      %38 = arith.subf %34, %37 : vector<128x128xf32>
      %39 = math.exp %38 : vector<128x128xf32>
      %cst_31 = arith.constant dense<0.000000e+00> : vector<128xf32>
      %40 = vector.multi_reduction <add>, %39, %cst_31 [1] : vector<128x128xf32> to vector<128xf32>
      %41 = vector.shape_cast %40 : vector<128xf32> to vector<128x1xf32>
      %42 = math.log %41 : vector<128x1xf32>
      %43 = vector.broadcast %42 : vector<128x1xf32> to vector<128x128xf32>
      %44 = arith.subf %38, %43 : vector<128x128xf32>
      %c0_32 = arith.constant 0 : index
      %c0_33 = arith.constant 0 : index
      %45 = vector.load %arg11[%c0_32, %c0_33] : memref<128x128xf32, #tpu.memory_space<vmem>>, vector<128x128xf32>
      tpu.vector_store %arg11[%c0_32, %c0_33], %44 {strides = array<i32>} : memref<128x128xf32, #tpu.memory_space<vmem>>, vector<128x128xf32>,
    } else {
    }
    return
  }
  func.func @transform_0(%arg0: i32, %arg1: i32) -> (i32, i32) {
    %c0_i32 = arith.constant 0 : i32
    %c0_i32_0 = arith.constant 0 : i32
    return %arg0, %c0_i32 : i32, i32
  }
  func.func @transform_1(%arg0: i32, %arg1: i32) -> (i32, i32) {
    %c0_i32 = arith.constant 0 : i32
    %c0_i32_0 = arith.constant 0 : i32
    return %arg1, %c0_i32 : i32, i32
  }
  func.func @transform_2(%arg0: i32, %arg1: i32) -> (i32, i32) {
    %c0_i32 = arith.constant 0 : i32
    return %arg0, %arg1 : i32, i32
  }
  func.func @transform_3(%arg0: i32, %arg1: i32) -> (i32, i32) {
    %c0_i32 = arith.constant 0 : i32
    %c0_i32_0 = arith.constant 0 : i32
    return %arg0, %c0_i32 : i32, i32
  }
  func.func @transform_4(%arg0: i32, %arg1: i32) -> (i32, i32) {
    %c0_i32 = arith.constant 0 : i32
    %c0_i32_0 = arith.constant 0 : i32
    %c0_i32_1 = arith.constant 0 : i32
    return %c0_i32, %c0_i32_0 : i32, i32
  }
  func.func @transform_5(%arg0: i32, %arg1: i32) -> (i32, i32) {
    %c0_i32 = arith.constant 0 : i32
    %c0_i32_0 = arith.constant 0 : i32
    %c0_i32_1 = arith.constant 0 : i32
    return %c0_i32, %c0_i32_0 : i32, i32
  }
  func.func @transform_6(%arg0: i32, %arg1: i32) -> (i32, i32) {
    %c0_i32 = arith.constant 0 : i32
    %c0_i32_0 = arith.constant 0 : i32
    %c0_i32_1 = arith.constant 0 : i32
    return %c0_i32, %c0_i32_0 : i32, i32
  }
  func.func @transform_7(%arg0: i32, %arg1: i32) -> (i32, i32) {
    %c0_i32 = arith.constant 0 : i32
    %c0_i32_0 = arith.constant 0 : i32
    %c0_i32_1 = arith.constant 0 : i32
    return %c0_i32, %c0_i32_0 : i32, i32
  }
  func.func @transform_8(%arg0: i32, %arg1: i32) -> (i32, i32) {
    %c0_i32 = arith.constant 0 : i32
    %c0_i32_0 = arith.constant 0 : i32
    %c0_i32_1 = arith.constant 0 : i32
    return %c0_i32, %c0_i32_0 : i32, i32
  }
  func.func @transform_9(%arg0: i32, %arg1: i32) -> (i32, i32) {
    %c0_i32 = arith.constant 0 : i32
    %c0_i32_0 = arith.constant 0 : i32
    return %arg0, %c0_i32 : i32, i32
  }
}

</mosaic_0001>

<bundles_post_ra>
// kernel: sage_forward.3
= control target key start
LH: loop header
LB: loop body
LE: loop exit
PB: predicated region body
PF: predicated region fallthrough
CT: control target
= control target key end

     0   :  { %v1535_v1 = vmov 0   ;;  %s1918_s1 = inlined_call_operand.vmem [shape: bf16[128,128], index: 1, kind: input, shape index: {}, may-alias: {0,1}]   ;;  %s1919_s2 = inlined_call_operand.vmem [shape: s8[128,128], index: 2, kind: input, shape index: {}]   ;;  %s1920_s3 = inlined_call_operand.vmem [shape: f32[128,1], index: 3, kind: input, shape index: {}]   ;;  %s1921_s4 = inlined_call_operand.vmem [shape: bf16[128,128], index: 4, kind: input, shape index: {}]   ;;  %s1922_s5 = inlined_call_operand.vmem [shape: bf16[128,128], index: 5, kind: input, shape index: {}]   ;;  %s1923_s0 = inlined_call_operand.vmem [shape: bf16[128,128], index: 0, kind: input, shape index: {}, may-alias: {0,1}]   ;;  %s1924_s7 = inlined_call_operand.vmem [shape: bf16[128,128], index: 7, kind: input, shape index: {}]   ;;  %s1925_s6 = inlined_call_operand.vmem [shape: f32[1,128], index: 6, kind: input, shape index: {}]   ;;  %s1926_s8 = inlined_call_operand.vmem [shape: f32[1,128], index: 8, kind: input, shape index: {}]   ;;  %s1927_s9 = inlined_call_operand.vmem [shape: f32[128,128], index: 9, kind: output, shape index: {}]  }
   0x1   :  { %v1431_v0 = vld [vmem:[%s1918_s1 + $0x38] sm:$0xff]   ;;  %1429 = vset.pattern.permute.xlu0 %v1535_v1  ;;  %1430 = vset.pattern.permute.xlu1 %v1535_v1  ;;  %v1432_v2 = vld [vmem:[%s1918_s1 + $0x30] sm:$0xff]   ;;  %v1433_v3 = vld [vmem:[%s1918_s1 + $0x28] sm:$0xff]  }
   0x2   :  { %1300 = vmatprep.subr.bf16.mxu0 %v1431_v0  ;;  %v1434_v4 = vld [vmem:[%s1918_s1 + $0x20] sm:$0xff]   ;;  %v295_v8 = vld [vmem:[%s1920_s3 + $0x10] sm:$0xff]  ;;  %v294_v9 = vld [vmem:[%s1920_s3 + $0x8] sm:$0xff] }
   0x3   :  { %1301 = vmatpush3.bf16.msra.mxu0 %v1431_v0  ;;  %v1601_v5 = vld [vmem:[%s1919_s2] sm:$0xff]  ;;  %321 = vperm.xlu1 %1430, %v295_v8   ;;  %v296_v10 = vld [vmem:[%s1920_s3 + $0x18] sm:$0xff]  ;;  %v298_v13 = vld [vmem:[%s1920_s3 + $0x28] sm:$0xff] }
   0x4   :  { %1302 = vmatprep.subr.bf16.mxu0 %v1432_v2  ;;  %v73_v6 = vunpack.c.l.s8.bf16 %v1601_v5  ;;  %v293_v7 = vld [vmem:[%s1920_s3] sm:$0xff]  ;;  %v1435_v11 = vld [vmem:[%s1918_s1 + $0x18] sm:$0xff]   ;;  %v1436_v14 = vld [vmem:[%s1918_s1 + $0x10] sm:$0xff]   ;;  %v74_v30 = vunpack.c.h.s8.bf16 %v1601_v5 }
   0x5   :  { %311 = vperm.xlu0 %1429, %v293_v7   ;;  %v297_v12 = vld [vmem:[%s1920_s3 + $0x20] sm:$0xff]  ;;  %v299_v15 = vld [vmem:[%s1920_s3 + $0x30] sm:$0xff]  ;;  %v1441_v16 = vld [vmem:[%s1922_s5 + $0x38] sm:$0xff]  }
   0x6   :  { %1316 = vmatprep.mubr.bf16.mxu0 %v73_v6  ;;  %v300_v17 = vld [vmem:[%s1920_s3 + $0x38] sm:$0xff]  ;;  %1332 = vmatprep.subr.bf16.mxu1 %v1441_v16  ;;  %v1443_v18 = vld [vmem:[%s1922_s5 + $0x30] sm:$0xff]   ;;  %v1437_v19 = vld [vmem:[%s1918_s1 + $0x8] sm:$0xff]  }
   0x7   :  { %1303 = vmatpush3.bf16.msra.mxu0 %v1432_v2  ;;  %326 = vperm.xlu1 %1430, %v296_v10   ;;  %v1445_v20 = vld [vmem:[%s1922_s5 + $0x28] sm:$0xff]   ;;  %v1438_v21 = vld [vmem:[%s1918_s1] sm:$0xff]   ;;  %v303_v24 = vld [vmem:[%s1920_s3 + $0x50] sm:$0xff] }
   0x8   :  { %1304 = vmatprep.subr.bf16.mxu0 %v1433_v3  ;;  %1333 = vmatpush3.bf16.msra.mxu1 %v1441_v16  ;;  %v301_v22 = vld [vmem:[%s1920_s3 + $0x40] sm:$0xff]  ;;  %v302_v23 = vld [vmem:[%s1920_s3 + $0x48] sm:$0xff]  ;;  %v304_v25 = vld [vmem:[%s1920_s3 + $0x58] sm:$0xff] }
   0x9   :  { %316 = vperm.xlu0 %1429, %v294_v9   ;;  %1334 = vmatprep.subr.bf16.mxu1 %v1443_v18  ;;  %v1447_v26 = vld [vmem:[%s1922_s5 + $0x20] sm:$0xff]   ;;  %v70_v27 = vld [vmem:[%s1919_s2 + $0x8] sm:$0xff]  ;;  %v1439_v28 = vld [vmem:[%s1921_s4 + $0x38] sm:$0xff]  }
   0xa   :  { %v1449_v29 = vld [vmem:[%s1922_s5 + $0x18] sm:$0xff]   ;;  %v75_v31 = vunpack.c.l.s8.bf16 %v70_v27  ;;  %v305_v32 = vld [vmem:[%s1920_s3 + $0x60] sm:$0xff]  ;;  %v306_v33 = vld [vmem:[%s1920_s3 + $0x68] sm:$0xff]  ;;  %v76_v39 = vunpack.c.h.s8.bf16 %v70_v27 }
   0xb   :  { %1305 = vmatpush3.bf16.msra.mxu0 %v1433_v3  ;;  %336 = vperm.xlu1 %1430, %v298_v13   ;;  %v1440_v34 = vld [vmem:[%s1921_s4 + $0x30] sm:$0xff]   ;;  %v308_v37 = vld [vmem:[%s1920_s3 + $0x78] sm:$0xff]  ;;  %v1442_v38 = vld [vmem:[%s1921_s4 + $0x28] sm:$0xff]  }
   0xc   :  { %1306 = vmatprep.subr.bf16.mxu0 %v1434_v4  ;;  %1335 = vmatpush3.bf16.msra.mxu1 %v1443_v18  ;;  %v307_v35 = vld [vmem:[%s1920_s3 + $0x70] sm:$0xff]  ;;  %v1444_v41 = vld [vmem:[%s1921_s4 + $0x20] sm:$0xff]   ;;  %v72_v42 = vld [vmem:[%s1919_s2 + $0x18] sm:$0xff] }
   0xd   :  { %331 = vperm.xlu0 %1429, %v297_v12   ;;  %1336 = vmatprep.subr.bf16.mxu1 %v1445_v20  ;;  %v71_v36 = vld [vmem:[%s1919_s2 + $0x10] sm:$0xff]  ;;  %v1446_v43 = vld [vmem:[%s1921_s4 + $0x18] sm:$0xff]   ;;  %v79_v45 = vunpack.c.l.s8.bf16 %v72_v42  ;;  %v1450_v47 = vld [vmem:[%s1921_s4 + $0x8] sm:$0xff]   ;;  %v80_v48 = vunpack.c.h.s8.bf16 %v72_v42 }
   0xe   :  { %v77_v40 = vunpack.c.l.s8.bf16 %v71_v36  ;;  %v78_v44 = vunpack.c.h.s8.bf16 %v71_v36  ;;  %v1448_v46 = vld [vmem:[%s1921_s4 + $0x10] sm:$0xff]   ;;  %v1452_v50 = vld [vmem:[%s1921_s4] sm:$0xff]   ;;  %v1453_v51 = vld [vmem:[%s1922_s5 + $0x8] sm:$0xff]  }
   0xf   :  { %1307 = vmatpush3.bf16.msra.mxu0 %v1434_v4  ;;  %346 = vperm.xlu1 %1430, %v300_v17   ;;  %v1451_v49 = vld [vmem:[%s1922_s5 + $0x10] sm:$0xff]   ;;  %v1454_v52 = vld [vmem:[%s1923_s0] sm:$0xff]   ;;  %v1455_v53 = vld [vmem:[%s1923_s0 + $0x8] sm:$0xff]  }
  0x10   :  { %1308 = vmatprep.subr.bf16.mxu0 %v1435_v11  ;;  %1337 = vmatpush3.bf16.msra.mxu1 %v1445_v20  ;;  %v1456_v54 = vld [vmem:[%s1922_s5] sm:$0xff]   ;;  %v1457_v55 = vld [vmem:[%s1923_s0 + $0x10] sm:$0xff]   ;;  %v1458_v56 = vld [vmem:[%s1923_s0 + $0x18] sm:$0xff]  }
  0x11   :  { %341 = vperm.xlu0 %1429, %v299_v15   ;;  %1338 = vmatprep.subr.bf16.mxu1 %v1447_v26  ;;  %v1459_v57 = vld [vmem:[%s1923_s0 + $0x20] sm:$0xff]   ;;  %v1460_v58 = vld [vmem:[%s1923_s0 + $0x28] sm:$0xff]   ;;  %v1461_v59 = vld [vmem:[%s1923_s0 + $0x30] sm:$0xff]  }
  0x12   :  { %v1462_v60 = vld [vmem:[%s1923_s0 + $0x38] sm:$0xff]   ;;  %v1464_v18 = vld [vmem:[%s1924_s7 + $0x30] sm:$0xff]  }
  0x13   :  { %1309 = vmatpush3.bf16.msra.mxu0 %v1435_v11  ;;  %356 = vperm.xlu1 %1430, %v302_v23   ;;  %v1463_v61 = vld [vmem:[%s1924_s7 + $0x38] sm:$0xff]  }
  0x14   :  { %1310 = vmatprep.subr.bf16.mxu0 %v1436_v14  ;;  %1339 = vmatpush3.bf16.msra.mxu1 %v1447_v26 }
  0x15   :  { %351 = vperm.xlu0 %1429, %v301_v22   ;;  %1340 = vmatprep.subr.bf16.mxu1 %v1449_v29 }
  0x17   :  { %1311 = vmatpush3.bf16.msra.mxu0 %v1436_v14  ;;  %366 = vperm.xlu1 %1430, %v304_v25  }
  0x18   :  { %1312 = vmatprep.subr.bf16.mxu0 %v1437_v19  ;;  %1341 = vmatpush3.bf16.msra.mxu1 %v1449_v29 }
  0x19   :  { %361 = vperm.xlu0 %1429, %v303_v24   ;;  %1342 = vmatprep.subr.bf16.mxu1 %v1451_v49  ;;  %v1465_v24 = vld [vmem:[%s1924_s7 + $0x28] sm:$0xff]  }
  0x1b   :  { %1313 = vmatpush3.bf16.msra.mxu0 %v1437_v19  ;;  %376 = vperm.xlu1 %1430, %v306_v33   ;;  %v1466_v33 = vld [vmem:[%s1924_s7 + $0x20] sm:$0xff]  }
  0x1c   :  { %1314 = vmatprep.subr.bf16.mxu0 %v1438_v21  ;;  %1343 = vmatpush3.bf16.msra.mxu1 %v1451_v49 }
  0x1d   :  { %371 = vperm.xlu0 %1429, %v305_v32   ;;  %1344 = vmatprep.subr.bf16.mxu1 %v1453_v51 }
  0x1f   :  { %1315 = vmatpush3.bf16.msra.mxu0 %v1438_v21  ;;  %386 = vperm.xlu1 %1430, %v308_v37  }
  0x20   :  { %1364 = vmatprep.subr.bf16.mxu0 %v1439_v28  ;;  %1345 = vmatpush3.bf16.msra.mxu1 %v1453_v51 }
  0x21   :  { %381 = vperm.xlu0 %1429, %v307_v35   ;;  %1346 = vmatprep.subr.bf16.mxu1 %v1456_v54 }
  0x22   :  { %1317 = vmatmul.mubr.bf16.vlgmr.msra.gmra.mxu0 %v74_v30 }
  0x23   :  { %1320 = vmatprep.mubr.bf16.mxu0 %v75_v31  ;;  %1365 = vmatpush3.bf16.msra.mxu0 %v1439_v28 }
  0x24   :  { %1366 = vmatprep.subr.bf16.mxu0 %v1440_v34  ;;  %1347 = vmatpush3.bf16.msra.mxu1 %v1456_v54 }
  0x25   :  { %1396 = vmatprep.subr.bf16.mxu1 %v1463_v61 }
  0x27   :  { %1367 = vmatpush3.bf16.msra.mxu0 %v1440_v34 }
  0x28   :  { %1368 = vmatprep.subr.bf16.mxu0 %v1442_v38 }
  0x2a   :  { %1321 = vmatmul.mubr.bf16.gmra.mxu0 %v76_v39 }
  0x2b   :  { %1324 = vmatprep.mubr.bf16.mxu0 %v77_v40  ;;  %1369 = vmatpush3.bf16.msra.mxu0 %v1442_v38  ;;  %v1467_v38 = vld [vmem:[%s1924_s7 + $0x18] sm:$0xff]  }
  0x2c   :  { %1370 = vmatprep.subr.bf16.mxu0 %v1444_v41 }
  0x2f   :  { %1371 = vmatpush3.bf16.msra.mxu0 %v1444_v41 }
  0x30   :  { %1372 = vmatprep.subr.bf16.mxu0 %v1446_v43 }
  0x32   :  { %1325 = vmatmul.mubr.bf16.gmra.mxu0 %v78_v44 }
  0x33   :  { %1328 = vmatprep.mubr.bf16.mxu0 %v79_v45  ;;  %1373 = vmatpush3.bf16.msra.mxu0 %v1446_v43 }
  0x34   :  { %1374 = vmatprep.subr.bf16.mxu0 %v1448_v46 }
  0x37   :  { %1375 = vmatpush3.bf16.msra.mxu0 %v1448_v46 }
  0x38   :  { %1376 = vmatprep.subr.bf16.mxu0 %v1450_v47 }
  0x3a   :  { %1329 = vmatmul.mubr.bf16.gmra.mxu0 %v80_v48 }
  0x3b   :  { %1377 = vmatpush3.bf16.msra.mxu0 %v1450_v47  ;;  %1380 = vmatprep.mubr.bf16.mxu0 %v1454_v52 }
  0x3c   :  { %1378 = vmatprep.subr.bf16.mxu0 %v1452_v50 }
  0x3f   :  { %1379 = vmatpush3.bf16.msra.mxu0 %v1452_v50 }
  0x42   :  { %1381 = vmatmul.mubr.bf16.vlgmr.msra.gmra.mxu0 %v1455_v53 }
  0x43   :  { %1384 = vmatprep.mubr.bf16.mxu0 %v1457_v55 }
  0x4a   :  { %1385 = vmatmul.mubr.bf16.gmra.mxu0 %v1458_v56 }
  0x4b   :  { %1388 = vmatprep.mubr.bf16.mxu0 %v1459_v57 }
  0x52   :  { %1389 = vmatmul.mubr.bf16.gmra.mxu0 %v1460_v58  ;;  %v1468_v58 = vld [vmem:[%s1924_s7 + $0x10] sm:$0xff]  }
  0x53   :  { %1392 = vmatprep.mubr.bf16.mxu0 %v1461_v59  ;;  %v1469_v59 = vld [vmem:[%s1924_s7 + $0x8] sm:$0xff]  }
  0x5a   :  { %1393 = vmatmul.mubr.bf16.gmra.mxu0 %v1462_v60  ;;  %v1470_v60 = vld [vmem:[%s1924_s7] sm:$0xff]  }
  0x7e   :  { %v322_v62 = vpop.permute.xlu1 %321 }
  0x80   :  { %v312_v63 = vpop.permute.xlu0 %311 }
  0x82   :  { %v327_v0 = vpop.permute.xlu1 %326 }
  0x84   :  { %v317_v1 = vpop.permute.xlu0 %316 }
  0x86   :  { %v337_v2 = vpop.permute.xlu1 %336 }
  0x88   :  { %v332_v4 = vpop.permute.xlu0 %331 }
  0x8a   :  { %v347_v7 = vpop.permute.xlu1 %346 }
  0x8c   :  { %v342_v10 = vpop.permute.xlu0 %341 }
  0x8e   :  { %v357_v19 = vpop.permute.xlu1 %356 }
  0x90   :  { %v352_v21 = vpop.permute.xlu0 %351 }
  0x92   :  { %v367_v29 = vpop.permute.xlu1 %366 }
  0x94   :  { %v362_v34 = vpop.permute.xlu0 %361 }
  0x96   :  { %v377_v39 = vpop.permute.xlu1 %376 }
  0x98   :  { %v372_v44 = vpop.permute.xlu0 %371 }
  0x9a   :  { %v387_v49 = vpop.permute.xlu1 %386 }
  0x9c   :  { %v382_v52 = vpop.permute.xlu0 %381 }
  0xe2   :  { %v1318_v3 = vpop.f32.mrf.mxu0 }
  0xe3   :  { %v391_v13 = vmul.f32 %v1318_v3, %v322_v62 }
  0xe4   :  { %v179_v5 = vpop.f32.mrf.mxu0 }
  0xe5   :  { %v389_v11 = vmul.f32 %v312_v63, %v179_v5 }
  0xe6   :  { %v1319_v6 = vpop.f32.mrf.mxu0 }
  0xe7   :  { %v392_v8 = vmul.f32 %v1319_v6, %v327_v0 }
  0xe8   :  { %v182_v9 = vpop.f32.mrf.mxu0 }
  0xe9   :  { %v390_v12 = vmul.f32 %v317_v1, %v182_v9  ;;  %v406_v16 = vpack.c.bf16 %v392_v8, %v391_v13 }
  0xea   :  { %v1322_v14 = vpop.f32.mrf.mxu0 }
  0xeb   :  { %v405_v15 = vpack.c.bf16 %v390_v12, %v389_v11  ;;  %v395_v27 = vmul.f32 %v1322_v14, %v342_v10  ;;  %v1773_v11 = vld [vmem:[%s1925_s6] ss:$0 sm:$0xff] }
  0xec   :  { %v195_v17 = vpop.f32.mrf.mxu0 }
  0xed   :  { %1348 = vmatprep.mubr.bf16.mxu1 %v405_v15  ;;  %v393_v25 = vmul.f32 %v332_v4, %v195_v17 }
  0xee   :  { %v1323_v20 = vpop.f32.mrf.mxu0  ;;  %1349 = vmatmul.mubr.bf16.vlgmr.msra.gmra.mxu1 %v406_v16 }
  0xef   :  { %1397 = vmatpush3.bf16.msra.mxu1 %v1463_v61  ;;  %v396_v22 = vmul.f32 %v1323_v20, %v347_v7 }
  0xf0   :  { %v198_v23 = vpop.f32.mrf.mxu0  ;;  %1398 = vmatprep.subr.bf16.mxu1 %v1464_v18 }
  0xf1   :  { %v394_v26 = vmul.f32 %v337_v2, %v198_v23  ;;  %v408_v31 = vpack.c.bf16 %v396_v22, %v395_v27 }
  0xf2   :  { %v1326_v28 = vpop.f32.mrf.mxu0 }
  0xf3   :  { %v407_v30 = vpack.c.bf16 %v394_v26, %v393_v25  ;;  %1399 = vmatpush3.bf16.msra.mxu1 %v1464_v18  ;;  %v399_v42 = vmul.f32 %v1326_v28, %v362_v34 }
  0xf4   :  { %v211_v32 = vpop.f32.mrf.mxu0  ;;  %1400 = vmatprep.subr.bf16.mxu1 %v1465_v24 }
  0xf5   :  { %1352 = vmatprep.mubr.bf16.mxu1 %v407_v30  ;;  %v397_v40 = vmul.f32 %v352_v21, %v211_v32 }
  0xf6   :  { %v1327_v35 = vpop.f32.mrf.mxu0  ;;  %1353 = vmatmul.mubr.bf16.gmra.mxu1 %v408_v31 }
  0xf7   :  { %1401 = vmatpush3.bf16.msra.mxu1 %v1465_v24  ;;  %v400_v36 = vmul.f32 %v1327_v35, %v367_v29 }
  0xf8   :  { %v214_v37 = vpop.f32.mrf.mxu0  ;;  %1402 = vmatprep.subr.bf16.mxu1 %v1466_v33 }
  0xf9   :  { %v398_v41 = vmul.f32 %v357_v19, %v214_v37  ;;  %v410_v46 = vpack.c.bf16 %v400_v36, %v399_v42 }
  0xfa   :  { %v1330_v43 = vpop.f32.mrf.mxu0 }
  0xfb   :  { %v409_v45 = vpack.c.bf16 %v398_v41, %v397_v40  ;;  %1403 = vmatpush3.bf16.msra.mxu1 %v1466_v33  ;;  %v403_v55 = vmul.f32 %v1330_v43, %v382_v52 }
  0xfc   :  { %v227_v47 = vpop.f32.mrf.mxu0  ;;  %1404 = vmatprep.subr.bf16.mxu1 %v1467_v38 }
  0xfd   :  { %1356 = vmatprep.mubr.bf16.mxu1 %v409_v45  ;;  %v401_v53 = vmul.f32 %v372_v44, %v227_v47 }
  0xfe   :  { %v1331_v48 = vpop.f32.mrf.mxu0  ;;  %1357 = vmatmul.mubr.bf16.gmra.mxu1 %v410_v46 }
  0xff   :  { %1405 = vmatpush3.bf16.msra.mxu1 %v1467_v38  ;;  %v404_v50 = vmul.f32 %v1331_v48, %v387_v49 }
 0x100   :  { %v230_v51 = vpop.f32.mrf.mxu0  ;;  %1406 = vmatprep.subr.bf16.mxu1 %v1468_v58 }
 0x101   :  { %v402_v54 = vmul.f32 %v377_v39, %v230_v51  ;;  %v412_v57 = vpack.c.bf16 %v404_v50, %v403_v55 }
 0x102   :  { %v1382_v61 = vpop.f32.mrf.mxu0 }
 0x103   :  { %v411_v56 = vpack.c.bf16 %v402_v54, %v401_v53  ;;  %1407 = vmatpush3.bf16.msra.mxu1 %v1468_v58 }
 0x104   :  { %1408 = vmatprep.subr.bf16.mxu1 %v1469_v59  ;;  %v736_v62 = vpop.f32.mrf.mxu0 }
 0x105   :  { %1360 = vmatprep.mubr.bf16.mxu1 %v411_v56 }
 0x106   :  { %1361 = vmatmul.mubr.bf16.gmra.mxu1 %v412_v57  ;;  %v1383_v63 = vpop.f32.mrf.mxu0 }
 0x107   :  { %1409 = vmatpush3.bf16.msra.mxu1 %v1469_v59 }
 0x108   :  { %1410 = vmatprep.subr.bf16.mxu1 %v1470_v60  ;;  %v739_v0 = vpop.f32.mrf.mxu0 }
 0x10a   :  { %v1386_v1 = vpop.f32.mrf.mxu0 }
 0x10b   :  { %1411 = vmatpush3.bf16.msra.mxu1 %v1470_v60 }
 0x10c   :  { %v752_v2 = vpop.f32.mrf.mxu0 }
 0x10e   :  { %v1387_v3 = vpop.f32.mrf.mxu0 }
 0x110   :  { %v755_v4 = vpop.f32.mrf.mxu0 }
 0x112   :  { %v1390_v7 = vpop.f32.mrf.mxu0 }
 0x114   :  { %v768_v14 = vpop.f32.mrf.mxu0 }
 0x116   :  { %v1391_v23 = vpop.f32.mrf.mxu0 }
 0x118   :  { %v771_v34 = vpop.f32.mrf.mxu0 }
 0x11a   :  { %v1394_v43 = vpop.f32.mrf.mxu0 }
 0x11c   :  { %v784_v53 = vpop.f32.mrf.mxu0 }
 0x1ae   :  { %v1350_v5 = vpop.f32.mrf.mxu1 }
 0x1af   :  { %v745_v9 = vadd.f32 %v1382_v61, %v1350_v5 }
 0x1b0   :  { %v543_v6 = vpop.f32.mrf.mxu1 }
 0x1b1   :  { %v737_v8 = vadd.f32 %v736_v62, %v543_v6  ;;  %v808_v18 = vadd.f32 %v1773_v11, %v745_v9  ;;  %v1395_v62 = vpop.f32.mrf.mxu0 }
 0x1b2   :  { %v1351_v10 = vpop.f32.mrf.mxu1 }
 0x1b3   :  { %v748_v12 = vadd.f32 %v1383_v63, %v1351_v10  ;;  %v806_v15 = vadd.f32 %v1773_v11, %v737_v8  ;;  %v824_v27 = vmax.f32 %v808_v18, 0.0  ;;  %v787_v8 = vpop.f32.mrf.mxu0 }
 0x1b4   :  { %v546_v13 = vpop.f32.mrf.mxu1 }
 0x1b5   :  { %v809_v16 = vadd.f32 %v1773_v11, %v748_v12  ;;  %v740_v17 = vadd.f32 %v739_v0, %v546_v13  ;;  %v822_v24 = vmax.f32 %v806_v15, 0.0 }
 0x1b6   :  { %v1354_v19 = vpop.f32.mrf.mxu1 }
 0x1b7   :  { %v807_v20 = vadd.f32 %v1773_v11, %v740_v17  ;;  %v825_v21 = vmax.f32 %v809_v16, 0.0  ;;  %v761_v28 = vadd.f32 %v1386_v1, %v1354_v19 }
 0x1b8   :  { %v559_v22 = vpop.f32.mrf.mxu1 }
 0x1b9   :  { %v823_v25 = vmax.f32 %v807_v20, 0.0  ;;  %v753_v26 = vadd.f32 %v752_v2, %v559_v22  ;;  %v839_v32 = vpack.c.bf16 %v825_v21, %v824_v27  ;;  %v812_v38 = vadd.f32 %v1773_v11, %v761_v28 }
 0x1ba   :  { %v1355_v29 = vpop.f32.mrf.mxu1 }
 0x1bb   :  { %v764_v30 = vadd.f32 %v1387_v3, %v1355_v29  ;;  %v838_v31 = vpack.c.bf16 %v823_v25, %v822_v24  ;;  %v810_v35 = vadd.f32 %v1773_v11, %v753_v26  ;;  %v828_v47 = vmax.f32 %v812_v38, 0.0 }
 0x1bc   :  { %v562_v33 = vpop.f32.mrf.mxu1 }
 0x1bd   :  { %v813_v36 = vadd.f32 %v1773_v11, %v764_v30  ;;  %v756_v37 = vadd.f32 %v755_v4, %v562_v33  ;;  %1412 = vmatprep.mubr.bf16.mxu1 %v838_v31  ;;  %v826_v44 = vmax.f32 %v810_v35, 0.0 }
 0x1be   :  { %v1358_v39 = vpop.f32.mrf.mxu1  ;;  %1413 = vmatmul.mubr.bf16.vlgmr.msra.gmra.mxu1 %v839_v32 }
 0x1bf   :  { %v811_v40 = vadd.f32 %v1773_v11, %v756_v37  ;;  %v829_v41 = vmax.f32 %v813_v36, 0.0  ;;  %v777_v48 = vadd.f32 %v1390_v7, %v1358_v39 }
 0x1c0   :  { %v575_v42 = vpop.f32.mrf.mxu1 }
 0x1c1   :  { %v827_v45 = vmax.f32 %v811_v40, 0.0  ;;  %v769_v46 = vadd.f32 %v768_v14, %v575_v42  ;;  %v841_v54 = vpack.c.bf16 %v829_v41, %v828_v47  ;;  %v816_v58 = vadd.f32 %v1773_v11, %v777_v48 }
 0x1c2   :  { %v1359_v49 = vpop.f32.mrf.mxu1 }
 0x1c3   :  { %v780_v50 = vadd.f32 %v1391_v23, %v1359_v49  ;;  %v840_v51 = vpack.c.bf16 %v827_v45, %v826_v44  ;;  %v814_v55 = vadd.f32 %v1773_v11, %v769_v46  ;;  %v832_v3 = vmax.f32 %v816_v58, 0.0  ;;  %v1227_v23 = vld [vmem:[%s1926_s8] ss:$0 sm:$0xff] }
 0x1c4   :  { %v578_v52 = vpop.f32.mrf.mxu1 }
 0x1c5   :  { %v817_v56 = vadd.f32 %v1773_v11, %v780_v50  ;;  %v772_v57 = vadd.f32 %v771_v34, %v578_v52  ;;  %1416 = vmatprep.mubr.bf16.mxu1 %v840_v51  ;;  %v830_v0 = vmax.f32 %v814_v55, 0.0 }
 0x1c6   :  { %v1362_v59 = vpop.f32.mrf.mxu1  ;;  %1417 = vmatmul.mubr.bf16.gmra.mxu1 %v841_v54 }
 0x1c7   :  { %v815_v60 = vadd.f32 %v1773_v11, %v772_v57  ;;  %v833_v61 = vmax.f32 %v817_v56, 0.0  ;;  %v793_v4 = vadd.f32 %v1394_v43, %v1362_v59 }
 0x1c8   :  { %v591_v63 = vpop.f32.mrf.mxu1 }
 0x1c9   :  { %v831_v1 = vmax.f32 %v815_v60, 0.0  ;;  %v785_v2 = vadd.f32 %v784_v53, %v591_v63  ;;  %v843_v10 = vpack.c.bf16 %v833_v61, %v832_v3  ;;  %v820_v15 = vadd.f32 %v1773_v11, %v793_v4 }
 0x1ca   :  { %v1363_v5 = vpop.f32.mrf.mxu1 }
 0x1cb   :  { %v796_v6 = vadd.f32 %v1395_v62, %v1363_v5  ;;  %v842_v7 = vpack.c.bf16 %v831_v1, %v830_v0  ;;  %v818_v12 = vadd.f32 %v1773_v11, %v785_v2  ;;  %v836_v20 = vmax.f32 %v820_v15, 0.0 }
 0x1cc   :  { %v594_v9 = vpop.f32.mrf.mxu1 }
 0x1cd   :  { %v821_v13 = vadd.f32 %v1773_v11, %v796_v6  ;;  %v788_v14 = vadd.f32 %v787_v8, %v594_v9  ;;  %1420 = vmatprep.mubr.bf16.mxu1 %v842_v7  ;;  %v834_v18 = vmax.f32 %v818_v12, 0.0 }
 0x1ce   :  { %1421 = vmatmul.mubr.bf16.gmra.mxu1 %v843_v10 }
 0x1cf   :  { %v819_v16 = vadd.f32 %v1773_v11, %v788_v14  ;;  %v837_v17 = vmax.f32 %v821_v13, 0.0 }
 0x1d1   :  { %v835_v19 = vmax.f32 %v819_v16, 0.0  ;;  %v845_v22 = vpack.c.bf16 %v837_v17, %v836_v20 }
 0x1d3   :  { %v844_v21 = vpack.c.bf16 %v835_v19, %v834_v18 }
 0x1d5   :  { %1424 = vmatprep.mubr.bf16.mxu1 %v844_v21 }
 0x1d6   :  { %1425 = vmatmul.mubr.bf16.gmra.mxu1 %v845_v22 }
 0x27e   :  { %v1414_v24 = vpop.f32.mrf.mxu1 }
 0x27f   :  { %v960_v25 = vadd.f32 %v1414_v24, %v1227_v23 }
 0x280   :  { %v951_v26 = vpop.f32.mrf.mxu1 }
 0x281   :  { %1018 = vmax.xlane.f32.xlu0 %v960_v25  ;;  %v952_v28 = vadd.f32 %v1227_v23, %v951_v26 }
 0x282   :  { %v1415_v27 = vpop.f32.mrf.mxu1 }
 0x283   :  { %v963_v31 = vadd.f32 %v1415_v27, %v1227_v23 }
 0x284   :  { %v954_v29 = vpop.f32.mrf.mxu1 }
 0x285   :  { %v955_v11 = vadd.f32 %v1227_v23, %v954_v29  ;;  %1014 = vmax.xlane.f32.xlu0 %v952_v28 }
 0x286   :  { %v1418_v30 = vpop.f32.mrf.mxu1 }
 0x287   :  { %1016 = vmax.xlane.f32.xlu1 %v955_v11  ;;  %v976_v33 = vadd.f32 %v1418_v30, %v1227_v23 }
 0x288   :  { %v967_v32 = vpop.f32.mrf.mxu1 }
 0x289   :  { %1020 = vmax.xlane.f32.xlu0 %v963_v31  ;;  %v968_v37 = vadd.f32 %v1227_v23, %v967_v32 }
 0x28a   :  { %v1419_v34 = vpop.f32.mrf.mxu1 }
 0x28b   :  { %v979_v35 = vadd.f32 %v1419_v34, %v1227_v23  ;;  %1026 = vmax.xlane.f32.xlu1 %v976_v33 }
 0x28c   :  { %v970_v36 = vpop.f32.mrf.mxu1 }
 0x28d   :  { %1028 = vmax.xlane.f32.xlu0 %v979_v35  ;;  %v971_v39 = vadd.f32 %v1227_v23, %v970_v36 }
 0x28e   :  { %v1422_v38 = vpop.f32.mrf.mxu1 }
 0x28f   :  { %1022 = vmax.xlane.f32.xlu1 %v968_v37  ;;  %v992_v41 = vadd.f32 %v1422_v38, %v1227_v23 }
 0x290   :  { %v983_v40 = vpop.f32.mrf.mxu1 }
 0x291   :  { %1024 = vmax.xlane.f32.xlu0 %v971_v39  ;;  %v984_v45 = vadd.f32 %v1227_v23, %v983_v40 }
 0x292   :  { %v1423_v42 = vpop.f32.mrf.mxu1 }
 0x293   :  { %v995_v43 = vadd.f32 %v1423_v42, %v1227_v23  ;;  %1034 = vmax.xlane.f32.xlu1 %v992_v41 }
 0x294   :  { %v986_v44 = vpop.f32.mrf.mxu1 }
 0x295   :  { %1036 = vmax.xlane.f32.xlu0 %v995_v43  ;;  %v987_v47 = vadd.f32 %v1227_v23, %v986_v44 }
 0x296   :  { %v1426_v46 = vpop.f32.mrf.mxu1 }
 0x297   :  { %1030 = vmax.xlane.f32.xlu1 %v984_v45  ;;  %v1794_v52 = vadd.f32 %v1426_v46, %v1227_v23 }
 0x298   :  { %v999_v48 = vpop.f32.mrf.mxu1 }
 0x299   :  { %v1000_v49 = vadd.f32 %v1227_v23, %v999_v48  ;;  %1032 = vmax.xlane.f32.xlu0 %v987_v47 }
 0x29a   :  { %v1427_v50 = vpop.f32.mrf.mxu1 }
 0x29b   :  { %1038 = vmax.xlane.f32.xlu1 %v1000_v49  ;;  %v1800_v54 = vadd.f32 %v1427_v50, %v1227_v23 }
 0x29c   :  { %v1002_v51 = vpop.f32.mrf.mxu1 }
 0x29d   :  { %v1796_v53 = vadd.f32 %v1227_v23, %v1002_v51 }
 0x29f   :  { %1042 = vmax.xlane.f32.xlu1 %v1794_v52  ;;  %1040 = vmax.xlane.f32.xlu0 %v1796_v53 }
 0x2a3   :  { %1044 = vmax.xlane.f32.xlu0 %v1800_v54 }
 0x30a   :  { %v1019_v55 = vpop.xlane.xlu0 %1018 }
 0x30b   :  { %v1803_v56 = vsub.f32 %v960_v25, %v1019_v55 }
 0x30d   :  { %v1066_v57 = vmul.f32 1.442695, %v1803_v56 }
 0x30e   :  { %v1015_v58 = vpop.xlane.xlu0 %1014 }
 0x30f   :  { %1471 = vpow2.f32 %v1066_v57  ;;  %v1806_v59 = vsub.f32 %v952_v28, %v1015_v58 }
 0x310   :  { %v1017_v60 = vpop.xlane.xlu1 %1016 }
 0x311   :  { %v1062_v61 = vmul.f32 1.442695, %v1806_v59  ;;  %v1809_v63 = vsub.f32 %v955_v11, %v1017_v60 }
 0x312   :  { %v1021_v62 = vpop.xlane.xlu0 %1020 }
 0x313   :  { %1473 = vpow2.f32 %v1062_v61  ;;  %v1811_v0 = vsub.f32 %v963_v31, %v1021_v62  ;;  %v1064_v5 = vmul.f32 1.442695, %v1809_v63 }
 0x314   :  { %v1027_v1 = vpop.xlane.xlu1 %1026 }
 0x315   :  { %v1068_v2 = vmul.f32 1.442695, %v1811_v0  ;;  %v1814_v3 = vsub.f32 %v976_v33, %v1027_v1 }
 0x316   :  { %v1029_v4 = vpop.xlane.xlu0 %1028 }
 0x317   :  { %1475 = vpow2.f32 %v1068_v2  ;;  %v1074_v6 = vmul.f32 1.442695, %v1814_v3  ;;  %v1818_v7 = vsub.f32 %v979_v35, %v1029_v4 }
 0x318   :  { %v1023_v8 = vpop.xlane.xlu1 %1022 }
 0x319   :  { %1477 = vpow2.f32 %v1074_v6  ;;  %v1820_v9 = vsub.f32 %v968_v37, %v1023_v8  ;;  %v1076_v12 = vmul.f32 1.442695, %v1818_v7 }
 0x31a   :  { %v1025_v10 = vpop.xlane.xlu0 %1024  ;;  %1479 = vpow2.f32 %v1064_v5 }
 0x31b   :  { %v1070_v13 = vmul.f32 1.442695, %v1820_v9  ;;  %v1824_v14 = vsub.f32 %v971_v39, %v1025_v10 }
 0x31c   :  { %v1472_v15 = vpop.eup %1471  ;;  %v1035_v16 = vpop.xlane.xlu1 %1034 }
 0x31d   :  { %1481 = vpow2.f32 %v1070_v13  ;;  %v1826_v17 = vsub.f32 %v992_v41, %v1035_v16  ;;  %1098 = vadd.xlane.f32.xlu1 %v1472_v15  ;;  %v1072_v19 = vmul.f32 1.442695, %v1824_v14 }
 0x31e   :  { %v1037_v18 = vpop.xlane.xlu0 %1036  ;;  %1483 = vpow2.f32 %v1076_v12 }
 0x31f   :  { %v1082_v20 = vmul.f32 1.442695, %v1826_v17  ;;  %v1830_v21 = vsub.f32 %v995_v43, %v1037_v18 }
 0x320   :  { %v1474_v22 = vpop.eup %1473  ;;  %v1031_v23 = vpop.xlane.xlu1 %1030 }
 0x321   :  { %1485 = vpow2.f32 %v1082_v20  ;;  %v1832_v24 = vsub.f32 %v984_v45, %v1031_v23  ;;  %1094 = vadd.xlane.f32.xlu1 %v1474_v22  ;;  %v1084_v26 = vmul.f32 1.442695, %v1830_v21 }
 0x322   :  { %v1033_v25 = vpop.xlane.xlu0 %1032  ;;  %1487 = vpow2.f32 %v1072_v19 }
 0x323   :  { %v1078_v27 = vmul.f32 1.442695, %v1832_v24  ;;  %v1836_v28 = vsub.f32 %v987_v47, %v1033_v25 }
 0x324   :  { %v1476_v29 = vpop.eup %1475  ;;  %v1039_v11 = vpop.xlane.xlu1 %1038 }
 0x325   :  { %1489 = vpow2.f32 %v1078_v27  ;;  %v1838_v30 = vsub.f32 %v1000_v49, %v1039_v11  ;;  %1100 = vadd.xlane.f32.xlu0 %v1476_v29  ;;  %v1080_v32 = vmul.f32 1.442695, %v1836_v28 }
 0x326   :  { %v1478_v31 = vpop.eup %1477  ;;  %1491 = vpow2.f32 %v1084_v26 }
 0x327   :  { %v1086_v33 = vmul.f32 1.442695, %v1838_v30  ;;  %1106 = vadd.xlane.f32.xlu1 %v1478_v31  ;;  %v1480_v34 = vpop.eup %1479 }
 0x328   :  { %v1043_v35 = vpop.xlane.xlu1 %1042  ;;  %v1041_v36 = vpop.xlane.xlu0 %1040 }
 0x329   :  { %1493 = vpow2.f32 %v1086_v33  ;;  %v1843_v37 = vsub.f32 %v1794_v52, %v1043_v35  ;;  %v1846_v38 = vsub.f32 %v1796_v53, %v1041_v36  ;;  %1096 = vadd.xlane.f32.xlu0 %v1480_v34 }
 0x32a   :  { %v1482_v39 = vpop.eup %1481  ;;  %1495 = vpow2.f32 %v1080_v32 }
 0x32b   :  { %v1090_v40 = vmul.f32 1.442695, %v1843_v37  ;;  %v1088_v41 = vmul.f32 1.442695, %v1846_v38  ;;  %1102 = vadd.xlane.f32.xlu1 %v1482_v39  ;;  %v1484_v42 = vpop.eup %1483 }
 0x32c   :  { %v1045_v43 = vpop.xlane.xlu0 %1044 }
 0x32d   :  { %1497 = vpow2.f32 %v1090_v40  ;;  %v1851_v44 = vsub.f32 %v1800_v54, %v1045_v43  ;;  %1108 = vadd.xlane.f32.xlu0 %v1484_v42 }
 0x32e   :  { %v1486_v45 = vpop.eup %1485  ;;  %1499 = vpow2.f32 %v1088_v41 }
 0x32f   :  { %v1092_v46 = vmul.f32 1.442695, %v1851_v44  ;;  %1114 = vadd.xlane.f32.xlu1 %v1486_v45  ;;  %v1488_v47 = vpop.eup %1487 }
 0x331   :  { %1104 = vadd.xlane.f32.xlu0 %v1488_v47  ;;  %1501 = vpow2.f32 %v1092_v46 }
 0x332   :  { %v1490_v48 = vpop.eup %1489 }
 0x333   :  { %1110 = vadd.xlane.f32.xlu1 %v1490_v48  ;;  %v1492_v49 = vpop.eup %1491 }
 0x335   :  { %1116 = vadd.xlane.f32.xlu0 %v1492_v49 }
 0x336   :  { %v1494_v50 = vpop.eup %1493 }
 0x337   :  { %1118 = vadd.xlane.f32.xlu1 %v1494_v50  ;;  %v1496_v51 = vpop.eup %1495 }
 0x339   :  { %1112 = vadd.xlane.f32.xlu0 %v1496_v51 }
 0x33a   :  { %v1498_v52 = vpop.eup %1497 }
 0x33b   :  { %1122 = vadd.xlane.f32.xlu1 %v1498_v52  ;;  %v1500_v53 = vpop.eup %1499 }
 0x33d   :  { %1120 = vadd.xlane.f32.xlu0 %v1500_v53 }
 0x33e   :  { %v1502_v54 = vpop.eup %1501 }
 0x341   :  { %1124 = vadd.xlane.f32.xlu0 %v1502_v54 }
 0x3a6   :  { %v1099_v55 = vpop.xlane.xlu1 %1098 }
 0x3a7   :  { %1503 = vlog2.f32 %v1099_v55 }
 0x3aa   :  { %v1095_v57 = vpop.xlane.xlu1 %1094 }
 0x3ab   :  { %1505 = vlog2.f32 %v1095_v57 }
 0x3ae   :  { %v1101_v58 = vpop.xlane.xlu0 %1100 }
 0x3af   :  { %1507 = vlog2.f32 %v1101_v58 }
 0x3b0   :  { %v1107_v60 = vpop.xlane.xlu1 %1106 }
 0x3b1   :  { %1509 = vlog2.f32 %v1107_v60 }
 0x3b2   :  { %v1097_v61 = vpop.xlane.xlu0 %1096 }
 0x3b3   :  { %1511 = vlog2.f32 %v1097_v61 }
 0x3b4   :  { %v1504_v62 = vpop.eup %1503  ;;  %v1103_v1 = vpop.xlane.xlu1 %1102 }
 0x3b5   :  { %v1131_v2 = vmul.f32 0.6931472, %v1504_v62  ;;  %1513 = vlog2.f32 %v1103_v1 }
 0x3b6   :  { %v1109_v4 = vpop.xlane.xlu0 %1108 }
 0x3b7   :  { %v1160_v5 = vsub.f32 %v1803_v56, %v1131_v2  ;;  %1515 = vlog2.f32 %v1109_v4 }
 0x3b8   :  { %v1506_v6 = vpop.eup %1505  ;;  %v1115_v8 = vpop.xlane.xlu1 %1114 }
 0x3b9   :  { %1176 = vst [vmem:[%s1927_s9 + $0x10] sm:$0xff] %v1160_v5  ;;  %v1127_v10 = vmul.f32 0.6931472, %v1506_v6  ;;  %1517 = vlog2.f32 %v1115_v8 }
 0x3ba   :  { %v1105_v12 = vpop.xlane.xlu0 %1104 }
 0x3bb   :  { %v1158_v13 = vsub.f32 %v1806_v59, %v1127_v10  ;;  %1519 = vlog2.f32 %v1105_v12 }
 0x3bc   :  { %v1508_v15 = vpop.eup %1507  ;;  %v1111_v16 = vpop.xlane.xlu1 %1110 }
 0x3bd   :  { %1174 = vst [vmem:[%s1927_s9] sm:$0xff] %v1158_v13  ;;  %v1133_v56 = vmul.f32 0.6931472, %v1508_v15  ;;  %1521 = vlog2.f32 %v1111_v16 }
 0x3be   :  { %v1510_v18 = vpop.eup %1509  ;;  %v1117_v19 = vpop.xlane.xlu0 %1116 }
 0x3bf   :  { %v1161_v20 = vsub.f32 %v1811_v0, %v1133_v56  ;;  %v1139_v22 = vmul.f32 0.6931472, %v1510_v18  ;;  %1523 = vlog2.f32 %v1117_v19 }
 0x3c0   :  { %v1512_v23 = vpop.eup %1511  ;;  %v1119_v25 = vpop.xlane.xlu1 %1118 }
 0x3c1   :  { %1177 = vst [vmem:[%s1927_s9 + $0x18] sm:$0xff] %v1161_v20  ;;  %v1164_v59 = vsub.f32 %v1814_v3, %v1139_v22  ;;  %v1129_v26 = vmul.f32 0.6931472, %v1512_v23  ;;  %1525 = vlog2.f32 %v1119_v25 }
 0x3c2   :  { %v1514_v27 = vpop.eup %1513  ;;  %v1113_v29 = vpop.xlane.xlu0 %1112 }
 0x3c3   :  { %1180 = vst [vmem:[%s1927_s9 + $0x30] sm:$0xff] %v1164_v59  ;;  %v1159_v0 = vsub.f32 %v1809_v63, %v1129_v26  ;;  %v1135_v11 = vmul.f32 0.6931472, %v1514_v27  ;;  %1527 = vlog2.f32 %v1113_v29 }
 0x3c4   :  { %v1516_v31 = vpop.eup %1515  ;;  %v1123_v32 = vpop.xlane.xlu1 %1122 }
 0x3c5   :  { %1175 = vst [vmem:[%s1927_s9 + $0x8] sm:$0xff] %v1159_v0  ;;  %v1162_v3 = vsub.f32 %v1820_v9, %v1135_v11  ;;  %v1141_v33 = vmul.f32 0.6931472, %v1516_v31  ;;  %1529 = vlog2.f32 %v1123_v32 }
 0x3c6   :  { %v1518_v34 = vpop.eup %1517  ;;  %v1121_v35 = vpop.xlane.xlu0 %1120 }
 0x3c7   :  { %1178 = vst [vmem:[%s1927_s9 + $0x20] sm:$0xff] %v1162_v3  ;;  %v1165_v63 = vsub.f32 %v1818_v7, %v1141_v33  ;;  %v1147_v36 = vmul.f32 0.6931472, %v1518_v34  ;;  %1531 = vlog2.f32 %v1121_v35 }
 0x3c8   :  { %v1520_v39 = vpop.eup %1519 }
 0x3c9   :  { %1181 = vst [vmem:[%s1927_s9 + $0x38] sm:$0xff] %v1165_v63  ;;  %v1168_v40 = vsub.f32 %v1826_v17, %v1147_v36  ;;  %v1137_v9 = vmul.f32 0.6931472, %v1520_v39 }
 0x3ca   :  { %v1522_v41 = vpop.eup %1521  ;;  %v1125_v42 = vpop.xlane.xlu0 %1124 }
 0x3cb   :  { %1184 = vst [vmem:[%s1927_s9 + $0x50] sm:$0xff] %v1168_v40  ;;  %v1163_v43 = vsub.f32 %v1824_v14, %v1137_v9  ;;  %v1143_v45 = vmul.f32 0.6931472, %v1522_v41  ;;  %1533 = vlog2.f32 %v1125_v42 }
 0x3cc   :  { %v1524_v7 = vpop.eup %1523 }
 0x3cd   :  { %1179 = vst [vmem:[%s1927_s9 + $0x28] sm:$0xff] %v1163_v43  ;;  %v1166_v46 = vsub.f32 %v1832_v24, %v1143_v45  ;;  %v1149_v47 = vmul.f32 0.6931472, %v1524_v7 }
 0x3ce   :  { %v1526_v17 = vpop.eup %1525 }
 0x3cf   :  { %1182 = vst [vmem:[%s1927_s9 + $0x40] sm:$0xff] %v1166_v46  ;;  %v1169_v48 = vsub.f32 %v1830_v21, %v1149_v47  ;;  %v1151_v49 = vmul.f32 0.6931472, %v1526_v17 }
 0x3d0   :  { %v1528_v50 = vpop.eup %1527 }
 0x3d1   :  { %1185 = vst [vmem:[%s1927_s9 + $0x58] sm:$0xff] %v1169_v48  ;;  %v1170_v14 = vsub.f32 %v1838_v30, %v1151_v49  ;;  %v1145_v51 = vmul.f32 0.6931472, %v1528_v50 }
 0x3d2   :  { %v1530_v52 = vpop.eup %1529 }
 0x3d3   :  { %1186 = vst [vmem:[%s1927_s9 + $0x60] sm:$0xff] %v1170_v14  ;;  %v1167_v24 = vsub.f32 %v1836_v28, %v1145_v51  ;;  %v1155_v53 = vmul.f32 0.6931472, %v1530_v52 }
 0x3d4   :  { %v1532_v54 = vpop.eup %1531 }
 0x3d5   :  { %1183 = vst [vmem:[%s1927_s9 + $0x48] sm:$0xff] %v1167_v24  ;;  %v1172_v21 = vsub.f32 %v1843_v37, %v1155_v53  ;;  %v1153_v55 = vmul.f32 0.6931472, %v1532_v54 }
 0x3d7   :  { %1188 = vst [vmem:[%s1927_s9 + $0x70] sm:$0xff] %v1172_v21  ;;  %v1171_v30 = vsub.f32 %v1846_v38, %v1153_v55 }
 0x3d8   :  { %v1534_v57 = vpop.eup %1533 }
 0x3d9   :  { %1187 = vst [vmem:[%s1927_s9 + $0x68] sm:$0xff] %v1171_v30  ;;  %v1157_v28 = vmul.f32 0.6931472, %v1534_v57 }
 0x3db   :  { %v1173_v58 = vsub.f32 %v1851_v44, %v1157_v28 }
 0x3dd   :  { %1189 = vst [vmem:[%s1927_s9 + $0x78] sm:$0xff] %v1173_v58 }

// kernel: sage_forward.2
= control target key start
LH: loop header
LB: loop body
LE: loop exit
PB: predicated region body
PF: predicated region fallthrough
CT: control target
= control target key end

     0   :  { %v1223_v1 = vmov 0   ;;  %s1517_s1 = inlined_call_operand.vmem [shape: bf16[128,128], index: 1, kind: input, shape index: {}, may-alias: {0,1}]   ;;  %s1518_s2 = inlined_call_operand.vmem [shape: s8[128,128], index: 2, kind: input, shape index: {}]   ;;  %s1519_s3 = inlined_call_operand.vmem [shape: f32[128,1], index: 3, kind: input, shape index: {}]   ;;  %s1520_s5 = inlined_call_operand.vmem [shape: bf16[128,128], index: 5, kind: input, shape index: {}]   ;;  %s1521_s4 = inlined_call_operand.vmem [shape: bf16[128,128], index: 4, kind: input, shape index: {}]   ;;  %s1522_s0 = inlined_call_operand.vmem [shape: bf16[128,128], index: 0, kind: input, shape index: {}, may-alias: {0,1}]   ;;  %s1523_s6 = inlined_call_operand.vmem [shape: f32[1,128], index: 6, kind: input, shape index: {}]   ;;  %s1524_s7 = inlined_call_operand.vmem [shape: bf16[128,128], index: 7, kind: output, shape index: {}]  }
   0x1   :  { %v1191_v0 = vld [vmem:[%s1517_s1 + $0x38] sm:$0xff]   ;;  %1189 = vset.pattern.permute.xlu0 %v1223_v1  ;;  %1190 = vset.pattern.permute.xlu1 %v1223_v1  ;;  %v1192_v2 = vld [vmem:[%s1517_s1 + $0x30] sm:$0xff]   ;;  %v1193_v3 = vld [vmem:[%s1517_s1 + $0x28] sm:$0xff]  }
   0x2   :  { %1076 = vmatprep.subr.bf16.mxu0 %v1191_v0  ;;  %v1194_v4 = vld [vmem:[%s1517_s1 + $0x20] sm:$0xff]   ;;  %v289_v8 = vld [vmem:[%s1519_s3 + $0x10] sm:$0xff]  ;;  %v288_v9 = vld [vmem:[%s1519_s3 + $0x8] sm:$0xff] }
   0x3   :  { %1077 = vmatpush3.bf16.msra.mxu0 %v1191_v0  ;;  %v1279_v5 = vld [vmem:[%s1518_s2] sm:$0xff]  ;;  %315 = vperm.xlu1 %1190, %v289_v8   ;;  %v290_v10 = vld [vmem:[%s1519_s3 + $0x18] sm:$0xff]  ;;  %v292_v13 = vld [vmem:[%s1519_s3 + $0x28] sm:$0xff] }
   0x4   :  { %1078 = vmatprep.subr.bf16.mxu0 %v1192_v2  ;;  %v67_v6 = vunpack.c.l.s8.bf16 %v1279_v5  ;;  %v287_v7 = vld [vmem:[%s1519_s3] sm:$0xff]  ;;  %v1195_v11 = vld [vmem:[%s1517_s1 + $0x18] sm:$0xff]   ;;  %v1196_v15 = vld [vmem:[%s1517_s1 + $0x10] sm:$0xff]   ;;  %v68_v30 = vunpack.c.h.s8.bf16 %v1279_v5 }
   0x5   :  { %305 = vperm.xlu0 %1189, %v287_v7   ;;  %v291_v12 = vld [vmem:[%s1519_s3 + $0x20] sm:$0xff]  ;;  %v1199_v14 = vld [vmem:[%s1520_s5 + $0x38] sm:$0xff]   ;;  %v1201_v16 = vld [vmem:[%s1520_s5 + $0x30] sm:$0xff]  }
   0x6   :  { %1092 = vmatprep.mubr.bf16.mxu0 %v67_v6  ;;  %1108 = vmatprep.subr.bf16.mxu1 %v1199_v14  ;;  %v1197_v17 = vld [vmem:[%s1517_s1 + $0x8] sm:$0xff]   ;;  %v293_v18 = vld [vmem:[%s1519_s3 + $0x30] sm:$0xff]  ;;  %v294_v19 = vld [vmem:[%s1519_s3 + $0x38] sm:$0xff] }
   0x7   :  { %1079 = vmatpush3.bf16.msra.mxu0 %v1192_v2  ;;  %320 = vperm.xlu1 %1190, %v290_v10   ;;  %v1203_v20 = vld [vmem:[%s1520_s5 + $0x28] sm:$0xff]   ;;  %v295_v21 = vld [vmem:[%s1519_s3 + $0x40] sm:$0xff]  ;;  %v297_v25 = vld [vmem:[%s1519_s3 + $0x50] sm:$0xff] }
   0x8   :  { %1080 = vmatprep.subr.bf16.mxu0 %v1193_v3  ;;  %1109 = vmatpush3.bf16.msra.mxu1 %v1199_v14  ;;  %v296_v22 = vld [vmem:[%s1519_s3 + $0x48] sm:$0xff]  ;;  %v1198_v23 = vld [vmem:[%s1517_s1] sm:$0xff]   ;;  %v298_v26 = vld [vmem:[%s1519_s3 + $0x58] sm:$0xff] }
   0x9   :  { %310 = vperm.xlu0 %1189, %v288_v9   ;;  %1110 = vmatprep.subr.bf16.mxu1 %v1201_v16  ;;  %v1205_v24 = vld [vmem:[%s1520_s5 + $0x20] sm:$0xff]   ;;  %v64_v27 = vld [vmem:[%s1518_s2 + $0x8] sm:$0xff]  ;;  %v1348_v28 = vld [vmem:[%s1521_s4 + $0x38] sm:$0xff]  }
   0xa   :  { %v1207_v29 = vld [vmem:[%s1520_s5 + $0x18] sm:$0xff]   ;;  %v69_v31 = vunpack.c.l.s8.bf16 %v64_v27  ;;  %v299_v32 = vld [vmem:[%s1519_s3 + $0x60] sm:$0xff]  ;;  %v300_v33 = vld [vmem:[%s1519_s3 + $0x68] sm:$0xff]  ;;  %v70_v40 = vunpack.c.h.s8.bf16 %v64_v27 }
   0xb   :  { %1081 = vmatpush3.bf16.msra.mxu0 %v1193_v3  ;;  %330 = vperm.xlu1 %1190, %v292_v13   ;;  %v1364_v34 = vld [vmem:[%s1521_s4 + $0x30] sm:$0xff]   ;;  %v302_v38 = vld [vmem:[%s1519_s3 + $0x78] sm:$0xff]  ;;  %v1383_v39 = vld [vmem:[%s1521_s4 + $0x28] sm:$0xff]  }
   0xc   :  { %1082 = vmatprep.subr.bf16.mxu0 %v1194_v4  ;;  %1111 = vmatpush3.bf16.msra.mxu1 %v1201_v16  ;;  %v1209_v35 = vld [vmem:[%s1520_s5 + $0x10] sm:$0xff]   ;;  %v1390_v42 = vld [vmem:[%s1521_s4 + $0x20] sm:$0xff]   ;;  %v66_v43 = vld [vmem:[%s1518_s2 + $0x18] sm:$0xff] }
   0xd   :  { %325 = vperm.xlu0 %1189, %v291_v12   ;;  %1112 = vmatprep.subr.bf16.mxu1 %v1203_v20  ;;  %v301_v36 = vld [vmem:[%s1519_s3 + $0x70] sm:$0xff]  ;;  %v1400_v44 = vld [vmem:[%s1521_s4 + $0x18] sm:$0xff]   ;;  %v73_v46 = vunpack.c.l.s8.bf16 %v66_v43  ;;  %v74_v47 = vunpack.c.h.s8.bf16 %v66_v43  ;;  %v1211_v49 = vld [vmem:[%s1520_s5 + $0x8] sm:$0xff]  }
   0xe   :  { %v65_v37 = vld [vmem:[%s1518_s2 + $0x10] sm:$0xff]  ;;  %v1418_v50 = vld [vmem:[%s1521_s4 + $0x8] sm:$0xff]   ;;  %v1213_v51 = vld [vmem:[%s1520_s5] sm:$0xff]  }
   0xf   :  { %1083 = vmatpush3.bf16.msra.mxu0 %v1194_v4  ;;  %340 = vperm.xlu1 %1190, %v294_v19   ;;  %v71_v41 = vunpack.c.l.s8.bf16 %v65_v37  ;;  %v72_v45 = vunpack.c.h.s8.bf16 %v65_v37  ;;  %v1408_v48 = vld [vmem:[%s1521_s4 + $0x10] sm:$0xff]   ;;  %v1428_v52 = vld [vmem:[%s1521_s4] sm:$0xff]   ;;  %v1216_v54 = vld [vmem:[%s1522_s0 + $0x8] sm:$0xff]  }
  0x10   :  { %1084 = vmatprep.subr.bf16.mxu0 %v1195_v11  ;;  %1113 = vmatpush3.bf16.msra.mxu1 %v1203_v20  ;;  %v1215_v53 = vld [vmem:[%s1522_s0] sm:$0xff]   ;;  %v1217_v55 = vld [vmem:[%s1522_s0 + $0x10] sm:$0xff]   ;;  %v1218_v56 = vld [vmem:[%s1522_s0 + $0x18] sm:$0xff]  }
  0x11   :  { %335 = vperm.xlu0 %1189, %v293_v18   ;;  %1114 = vmatprep.subr.bf16.mxu1 %v1205_v24 }
  0x13   :  { %1085 = vmatpush3.bf16.msra.mxu0 %v1195_v11  ;;  %350 = vperm.xlu1 %1190, %v296_v22  }
  0x14   :  { %1086 = vmatprep.subr.bf16.mxu0 %v1196_v15  ;;  %1115 = vmatpush3.bf16.msra.mxu1 %v1205_v24 }
  0x15   :  { %345 = vperm.xlu0 %1189, %v295_v21   ;;  %1116 = vmatprep.subr.bf16.mxu1 %v1207_v29 }
  0x17   :  { %1087 = vmatpush3.bf16.msra.mxu0 %v1196_v15  ;;  %360 = vperm.xlu1 %1190, %v298_v26  }
  0x18   :  { %1088 = vmatprep.subr.bf16.mxu0 %v1197_v17  ;;  %1117 = vmatpush3.bf16.msra.mxu1 %v1207_v29 }
  0x19   :  { %355 = vperm.xlu0 %1189, %v297_v25   ;;  %1118 = vmatprep.subr.bf16.mxu1 %v1209_v35 }
  0x1b   :  { %1089 = vmatpush3.bf16.msra.mxu0 %v1197_v17  ;;  %370 = vperm.xlu1 %1190, %v300_v33  }
  0x1c   :  { %1090 = vmatprep.subr.bf16.mxu0 %v1198_v23  ;;  %1119 = vmatpush3.bf16.msra.mxu1 %v1209_v35 }
  0x1d   :  { %365 = vperm.xlu0 %1189, %v299_v32   ;;  %1120 = vmatprep.subr.bf16.mxu1 %v1211_v49 }
  0x1f   :  { %1091 = vmatpush3.bf16.msra.mxu0 %v1198_v23  ;;  %380 = vperm.xlu1 %1190, %v302_v38  }
  0x20   :  { %1140 = vmatprep.subr.bf16.mxu0 %v1348_v28  ;;  %1121 = vmatpush3.bf16.msra.mxu1 %v1211_v49 }
  0x21   :  { %375 = vperm.xlu0 %1189, %v301_v36   ;;  %1122 = vmatprep.subr.bf16.mxu1 %v1213_v51 }
  0x22   :  { %1093 = vmatmul.mubr.bf16.vlgmr.msra.gmra.mxu0 %v68_v30 }
  0x23   :  { %1096 = vmatprep.mubr.bf16.mxu0 %v69_v31  ;;  %1141 = vmatpush3.bf16.msra.mxu0 %v1348_v28 }
  0x24   :  { %1142 = vmatprep.subr.bf16.mxu0 %v1364_v34  ;;  %1123 = vmatpush3.bf16.msra.mxu1 %v1213_v51 }
  0x25   :  { %1172 = vmatprep.subr.bf16.mxu1 %v1348_v28 }
  0x27   :  { %1143 = vmatpush3.bf16.msra.mxu0 %v1364_v34 }
  0x28   :  { %1144 = vmatprep.subr.bf16.mxu0 %v1383_v39 }
  0x2a   :  { %1097 = vmatmul.mubr.bf16.gmra.mxu0 %v70_v40 }
  0x2b   :  { %1100 = vmatprep.mubr.bf16.mxu0 %v71_v41  ;;  %1145 = vmatpush3.bf16.msra.mxu0 %v1383_v39 }
  0x2c   :  { %1146 = vmatprep.subr.bf16.mxu0 %v1390_v42 }
  0x2f   :  { %1147 = vmatpush3.bf16.msra.mxu0 %v1390_v42 }
  0x30   :  { %1148 = vmatprep.subr.bf16.mxu0 %v1400_v44 }
  0x32   :  { %1101 = vmatmul.mubr.bf16.gmra.mxu0 %v72_v45 }
  0x33   :  { %1104 = vmatprep.mubr.bf16.mxu0 %v73_v46  ;;  %1149 = vmatpush3.bf16.msra.mxu0 %v1400_v44 }
  0x34   :  { %1150 = vmatprep.subr.bf16.mxu0 %v1408_v48 }
  0x37   :  { %1151 = vmatpush3.bf16.msra.mxu0 %v1408_v48 }
  0x38   :  { %1152 = vmatprep.subr.bf16.mxu0 %v1418_v50 }
  0x3a   :  { %1105 = vmatmul.mubr.bf16.gmra.mxu0 %v74_v47 }
  0x3b   :  { %1153 = vmatpush3.bf16.msra.mxu0 %v1418_v50  ;;  %1156 = vmatprep.mubr.bf16.mxu0 %v1215_v53 }
  0x3c   :  { %1154 = vmatprep.subr.bf16.mxu0 %v1428_v52 }
  0x3f   :  { %1155 = vmatpush3.bf16.msra.mxu0 %v1428_v52 }
  0x42   :  { %1157 = vmatmul.mubr.bf16.vlgmr.msra.gmra.mxu0 %v1216_v54  ;;  %v1222_v54 = vld [vmem:[%s1522_s0 + $0x38] sm:$0xff]  }
  0x43   :  { %1160 = vmatprep.mubr.bf16.mxu0 %v1217_v55 }
  0x4a   :  { %1161 = vmatmul.mubr.bf16.gmra.mxu0 %v1218_v56 }
  0x7e   :  { %v316_v57 = vpop.permute.xlu1 %315 }
  0x80   :  { %v306_v58 = vpop.permute.xlu0 %305 }
  0x82   :  { %v321_v59 = vpop.permute.xlu1 %320 }
  0x84   :  { %v311_v60 = vpop.permute.xlu0 %310 }
  0x86   :  { %v331_v61 = vpop.permute.xlu1 %330 }
  0x88   :  { %v326_v63 = vpop.permute.xlu0 %325 }
  0x8a   :  { %v341_v2 = vpop.permute.xlu1 %340 }
  0x8c   :  { %v336_v5 = vpop.permute.xlu0 %335 }
  0x8e   :  { %v351_v13 = vpop.permute.xlu1 %350 }
  0x90   :  { %v346_v15 = vpop.permute.xlu0 %345 }
  0x92   :  { %v361_v22 = vpop.permute.xlu1 %360 }
  0x94   :  { %v356_v26 = vpop.permute.xlu0 %355 }
  0x96   :  { %v371_v30 = vpop.permute.xlu1 %370 }
  0xe2   :  { %v1094_v62 = vpop.f32.mrf.mxu0 }
  0xe3   :  { %v385_v8 = vmul.f32 %v1094_v62, %v316_v57 }
  0xe4   :  { %v173_v0 = vpop.f32.mrf.mxu0 }
  0xe5   :  { %v383_v6 = vmul.f32 %v306_v58, %v173_v0 }
  0xe6   :  { %v1095_v1 = vpop.f32.mrf.mxu0 }
  0xe7   :  { %v386_v3 = vmul.f32 %v1095_v1, %v321_v59 }
  0xe8   :  { %v176_v4 = vpop.f32.mrf.mxu0 }
  0xe9   :  { %v384_v7 = vmul.f32 %v311_v60, %v176_v4  ;;  %v400_v11 = vpack.c.bf16 %v386_v3, %v385_v8 }
  0xea   :  { %v1098_v9 = vpop.f32.mrf.mxu0 }
  0xeb   :  { %v399_v10 = vpack.c.bf16 %v384_v7, %v383_v6  ;;  %v389_v20 = vmul.f32 %v1098_v9, %v336_v5 }
  0xec   :  { %v189_v12 = vpop.f32.mrf.mxu0 }
  0xed   :  { %1124 = vmatprep.mubr.bf16.mxu1 %v399_v10  ;;  %v387_v18 = vmul.f32 %v326_v63, %v189_v12 }
  0xee   :  { %v1099_v14 = vpop.f32.mrf.mxu0  ;;  %1125 = vmatmul.mubr.bf16.vlgmr.msra.gmra.mxu1 %v400_v11 }
  0xef   :  { %1180 = vmatpush3.bf16.msra.mxu1 %v1348_v28  ;;  %v390_v16 = vmul.f32 %v1099_v14, %v341_v2 }
  0xf0   :  { %v192_v17 = vpop.f32.mrf.mxu0  ;;  %1173 = vmatprep.subr.bf16.mxu1 %v1364_v34 }
  0xf1   :  { %v388_v19 = vmul.f32 %v331_v61, %v192_v17  ;;  %v402_v24 = vpack.c.bf16 %v390_v16, %v389_v20 }
  0xf2   :  { %v1102_v21 = vpop.f32.mrf.mxu0 }
  0xf3   :  { %v401_v23 = vpack.c.bf16 %v388_v19, %v387_v18  ;;  %1181 = vmatpush3.bf16.msra.mxu1 %v1364_v34  ;;  %v393_v33 = vmul.f32 %v1102_v21, %v356_v26  ;;  %v366_v34 = vpop.permute.xlu0 %365 }
  0xf4   :  { %v205_v25 = vpop.f32.mrf.mxu0  ;;  %1174 = vmatprep.subr.bf16.mxu1 %v1383_v39 }
  0xf5   :  { %1128 = vmatprep.mubr.bf16.mxu1 %v401_v23  ;;  %v391_v31 = vmul.f32 %v346_v15, %v205_v25 }
  0xf6   :  { %v1103_v27 = vpop.f32.mrf.mxu0  ;;  %1129 = vmatmul.mubr.bf16.gmra.mxu1 %v402_v24 }
  0xf7   :  { %1182 = vmatpush3.bf16.msra.mxu1 %v1383_v39  ;;  %v394_v28 = vmul.f32 %v1103_v27, %v361_v22  ;;  %v381_v39 = vpop.permute.xlu1 %380  ;;  %v376_v45 = vpop.permute.xlu0 %375 }
  0xf8   :  { %v208_v29 = vpop.f32.mrf.mxu0  ;;  %1175 = vmatprep.subr.bf16.mxu1 %v1390_v42 }
  0xf9   :  { %v392_v32 = vmul.f32 %v351_v13, %v208_v29  ;;  %v404_v37 = vpack.c.bf16 %v394_v28, %v393_v33 }
  0xfa   :  { %v1106_v35 = vpop.f32.mrf.mxu0 }
  0xfb   :  { %v403_v36 = vpack.c.bf16 %v392_v32, %v391_v31  ;;  %1183 = vmatpush3.bf16.msra.mxu1 %v1390_v42  ;;  %v397_v49 = vmul.f32 %v1106_v35, %v376_v45  ;;  %v1219_v42 = vld [vmem:[%s1522_s0 + $0x20] sm:$0xff]  }
  0xfc   :  { %v221_v38 = vpop.f32.mrf.mxu0  ;;  %1176 = vmatprep.subr.bf16.mxu1 %v1400_v44 }
  0xfd   :  { %1132 = vmatprep.mubr.bf16.mxu1 %v403_v36  ;;  %v395_v46 = vmul.f32 %v366_v34, %v221_v38 }
  0xfe   :  { %v1107_v40 = vpop.f32.mrf.mxu0  ;;  %1133 = vmatmul.mubr.bf16.gmra.mxu1 %v404_v37 }
  0xff   :  { %1184 = vmatpush3.bf16.msra.mxu1 %v1400_v44  ;;  %v398_v41 = vmul.f32 %v1107_v40, %v381_v39  ;;  %v1220_v44 = vld [vmem:[%s1522_s0 + $0x28] sm:$0xff]  }
 0x100   :  { %v224_v43 = vpop.f32.mrf.mxu0  ;;  %1177 = vmatprep.subr.bf16.mxu1 %v1408_v48 }
 0x101   :  { %v396_v47 = vmul.f32 %v371_v30, %v224_v43  ;;  %v406_v53 = vpack.c.bf16 %v398_v41, %v397_v49 }
 0x103   :  { %v405_v51 = vpack.c.bf16 %v396_v47, %v395_v46  ;;  %1185 = vmatpush3.bf16.msra.mxu1 %v1408_v48  ;;  %v1221_v48 = vld [vmem:[%s1522_s0 + $0x30] sm:$0xff]  }
 0x104   :  { %1178 = vmatprep.subr.bf16.mxu1 %v1418_v50 }
 0x105   :  { %1136 = vmatprep.mubr.bf16.mxu1 %v405_v51 }
 0x106   :  { %1137 = vmatmul.mubr.bf16.gmra.mxu1 %v406_v53 }
 0x107   :  { %1186 = vmatpush3.bf16.msra.mxu1 %v1418_v50  ;;  %1164 = vmatprep.mubr.bf16.mxu1 %v1219_v42  ;;  %v1158_v50 = vpop.f32.mrf.mxu0 }
 0x108   :  { %1179 = vmatprep.subr.bf16.mxu1 %v1428_v52 }
 0x109   :  { %v730_v55 = vpop.f32.mrf.mxu0 }
 0x10b   :  { %1187 = vmatpush3.bf16.msra.mxu1 %v1428_v52  ;;  %v1159_v56 = vpop.f32.mrf.mxu0  ;;  %v1475_v52 = vld [vmem:[%s1523_s6] ss:$0 sm:$0xff] }
 0x10d   :  { %v733_v57 = vpop.f32.mrf.mxu0 }
 0x10e   :  { %1165 = vmatmul.mubr.bf16.vlgmr.msra.gmra.mxu1 %v1220_v44 }
 0x10f   :  { %1168 = vmatprep.mubr.bf16.mxu1 %v1221_v48  ;;  %v1162_v59 = vpop.f32.mrf.mxu0 }
 0x111   :  { %v746_v0 = vpop.f32.mrf.mxu0 }
 0x113   :  { %v1163_v8 = vpop.f32.mrf.mxu0 }
 0x115   :  { %v749_v19 = vpop.f32.mrf.mxu0 }
 0x116   :  { %1169 = vmatmul.mubr.bf16.gmra.mxu1 %v1222_v54 }
 0x1ae   :  { %v1126_v58 = vpop.f32.mrf.mxu1 }
 0x1af   :  { %v739_v60 = vadd.f32 %v1158_v50, %v1126_v58 }
 0x1b0   :  { %v537_v61 = vpop.f32.mrf.mxu1 }
 0x1b1   :  { %v731_v62 = vadd.f32 %v730_v55, %v537_v61  ;;  %v802_v1 = vadd.f32 %v1475_v52, %v739_v60 }
 0x1b2   :  { %v1127_v63 = vpop.f32.mrf.mxu1 }
 0x1b3   :  { %v742_v2 = vadd.f32 %v1159_v56, %v1127_v63  ;;  %v800_v4 = vadd.f32 %v1475_v52, %v731_v62  ;;  %v818_v9 = vmax.f32 %v802_v1, 0.0 }
 0x1b4   :  { %v540_v3 = vpop.f32.mrf.mxu1 }
 0x1b5   :  { %v803_v5 = vadd.f32 %v1475_v52, %v742_v2  ;;  %v734_v6 = vadd.f32 %v733_v57, %v540_v3  ;;  %v816_v14 = vmax.f32 %v800_v4, 0.0 }
 0x1b6   :  { %v1130_v7 = vpop.f32.mrf.mxu1 }
 0x1b7   :  { %v819_v10 = vmax.f32 %v803_v5, 0.0  ;;  %v801_v11 = vadd.f32 %v1475_v52, %v734_v6  ;;  %v755_v12 = vadd.f32 %v1162_v59, %v1130_v7 }
 0x1b8   :  { %v553_v13 = vpop.f32.mrf.mxu1 }
 0x1b9   :  { %v989_v15 = vpack.c.bf16 %v819_v10, %v818_v9  ;;  %v817_v16 = vmax.f32 %v801_v11, 0.0  ;;  %v747_v17 = vadd.f32 %v746_v0, %v553_v13  ;;  %v806_v21 = vadd.f32 %v1475_v52, %v755_v12 }
 0x1ba   :  { %v1131_v18 = vpop.f32.mrf.mxu1 }
 0x1bb   :  { %1021 = vst [vmem:[%s1524_s7 + $0x8] sm:$0xff] %v989_v15   ;;  %v984_v20 = vpack.c.bf16 %v817_v16, %v816_v14  ;;  %v758_v22 = vadd.f32 %v1163_v8, %v1131_v18  ;;  %v804_v24 = vadd.f32 %v1475_v52, %v747_v17  ;;  %v822_v28 = vmax.f32 %v806_v21, 0.0 }
 0x1bc   :  { %v556_v23 = vpop.f32.mrf.mxu1 }
 0x1bd   :  { %985 = vst [vmem:[%s1524_s7] sm:$0xff] %v984_v20   ;;  %v807_v25 = vadd.f32 %v1475_v52, %v758_v22  ;;  %v750_v26 = vadd.f32 %v749_v19, %v556_v23  ;;  %v820_v32 = vmax.f32 %v804_v24, 0.0 }
 0x1be   :  { %v1134_v27 = vpop.f32.mrf.mxu1 }
 0x1bf   :  { %v823_v29 = vmax.f32 %v807_v25, 0.0  ;;  %v805_v30 = vadd.f32 %v1475_v52, %v750_v26 }
 0x1c0   :  { %v569_v31 = vpop.f32.mrf.mxu1 }
 0x1c1   :  { %v999_v33 = vpack.c.bf16 %v823_v29, %v822_v28  ;;  %v821_v35 = vmax.f32 %v805_v30, 0.0 }
 0x1c2   :  { %v1135_v34 = vpop.f32.mrf.mxu1 }
 0x1c3   :  { %1023 = vst [vmem:[%s1524_s7 + $0x18] sm:$0xff] %v999_v33   ;;  %v994_v36 = vpack.c.bf16 %v821_v35, %v820_v32 }
 0x1c4   :  { %v572_v37 = vpop.f32.mrf.mxu1 }
 0x1c5   :  { %1022 = vst [vmem:[%s1524_s7 + $0x10] sm:$0xff] %v994_v36  }
 0x1c6   :  { %v1138_v38 = vpop.f32.mrf.mxu1 }
 0x1c8   :  { %v585_v40 = vpop.f32.mrf.mxu1 }
 0x1ca   :  { %v1139_v39 = vpop.f32.mrf.mxu1 }
 0x1cc   :  { %v588_v41 = vpop.f32.mrf.mxu1 }
 0x1ce   :  { %v1166_v43 = vpop.f32.mrf.mxu1 }
 0x1cf   :  { %v771_v45 = vadd.f32 %v1166_v43, %v1134_v27 }
 0x1d0   :  { %v762_v46 = vpop.f32.mrf.mxu1 }
 0x1d1   :  { %v763_v47 = vadd.f32 %v762_v46, %v569_v31  ;;  %v810_v51 = vadd.f32 %v1475_v52, %v771_v45 }
 0x1d2   :  { %v1167_v49 = vpop.f32.mrf.mxu1 }
 0x1d3   :  { %v774_v42 = vadd.f32 %v1167_v49, %v1135_v34  ;;  %v808_v44 = vadd.f32 %v1475_v52, %v763_v47  ;;  %v826_v55 = vmax.f32 %v810_v51, 0.0 }
 0x1d4   :  { %v765_v53 = vpop.f32.mrf.mxu1 }
 0x1d5   :  { %v811_v48 = vadd.f32 %v1475_v52, %v774_v42  ;;  %v766_v54 = vadd.f32 %v765_v53, %v572_v37  ;;  %v824_v60 = vmax.f32 %v808_v44, 0.0 }
 0x1d6   :  { %v1170_v50 = vpop.f32.mrf.mxu1 }
 0x1d7   :  { %v827_v56 = vmax.f32 %v811_v48, 0.0  ;;  %v809_v57 = vadd.f32 %v1475_v52, %v766_v54  ;;  %v787_v58 = vadd.f32 %v1170_v50, %v1138_v38 }
 0x1d8   :  { %v778_v59 = vpop.f32.mrf.mxu1 }
 0x1d9   :  { %v1009_v61 = vpack.c.bf16 %v827_v56, %v826_v55  ;;  %v825_v62 = vmax.f32 %v809_v57, 0.0  ;;  %v779_v63 = vadd.f32 %v778_v59, %v585_v40  ;;  %v814_v2 = vadd.f32 %v1475_v52, %v787_v58 }
 0x1da   :  { %v1171_v0 = vpop.f32.mrf.mxu1 }
 0x1db   :  { %1025 = vst [vmem:[%s1524_s7 + $0x28] sm:$0xff] %v1009_v61   ;;  %v1004_v1 = vpack.c.bf16 %v825_v62, %v824_v60  ;;  %v790_v3 = vadd.f32 %v1171_v0, %v1139_v39  ;;  %v812_v5 = vadd.f32 %v1475_v52, %v779_v63  ;;  %v830_v8 = vmax.f32 %v814_v2, 0.0 }
 0x1dc   :  { %v781_v4 = vpop.f32.mrf.mxu1 }
 0x1dd   :  { %1024 = vst [vmem:[%s1524_s7 + $0x20] sm:$0xff] %v1004_v1   ;;  %v815_v6 = vadd.f32 %v1475_v52, %v790_v3  ;;  %v782_v7 = vadd.f32 %v781_v4, %v588_v41  ;;  %v828_v11 = vmax.f32 %v812_v5, 0.0 }
 0x1df   :  { %v831_v9 = vmax.f32 %v815_v6, 0.0  ;;  %v813_v10 = vadd.f32 %v1475_v52, %v782_v7 }
 0x1e1   :  { %v1019_v12 = vpack.c.bf16 %v831_v9, %v830_v8  ;;  %v829_v13 = vmax.f32 %v813_v10, 0.0 }
 0x1e3   :  { %1027 = vst [vmem:[%s1524_s7 + $0x38] sm:$0xff] %v1019_v12   ;;  %v1014_v14 = vpack.c.bf16 %v829_v13, %v828_v11 }
 0x1e5   :  { %1026 = vst [vmem:[%s1524_s7 + $0x30] sm:$0xff] %v1014_v14  }

</bundles_post_ra>
